<compile_context>
chip_gen: v7x
topology: tpu7x:2x2x1
jax: 0.10.0
libtpu: 0.0.40
codegen_flags: <defaults>
</compile_context>

<pallas_src>
import functools

import jax
import jax.numpy as jnp
from jax.experimental import pallas as pl
from jax.experimental.pallas import tpu as pltpu

_OUT_PAD = 128       # padded lane width for the 10-class output
_NUM_CLASSES = 10
_SUBLANE = 8         # f32 sublane granularity


def _round_up(x, m):
    return ((x + m - 1) // m) * m


def _choose_tb(B, target):
    """Pick the batch tile size (all Python ints; B is static under jit)."""
    if B <= 2 * _SUBLANE:
        # Tiny batch: one tile covering the whole (minimally padded) batch.
        return _round_up(B, _SUBLANE)
    # v7x: cap at ~half the batch so the grid has >= 2 "parallel" steps and both
    # TensorCores get work (costs nothing on single-TC v5e/v6e).
    half = _round_up(-(-B // 2), _SUBLANE)
    tb_max = min(target, half)
    tb_max -= tb_max % _SUBLANE
    tb_max = max(tb_max, _SUBLANE)
    # Prefer a tile that divides B exactly so the wrapper never has to jnp.pad x
    # (padding materialises a full extra HBM read+write of the activations).
    for tb in range(tb_max, _SUBLANE - 1, -_SUBLANE):
        if B % tb == 0:
            return tb
    return tb_max  # fallback: minimal padding of the last tile


def _mlp_logsoftmax_kernel(x_ref, w1_ref, b1_ref, w2_ref, b2_ref, w3_ref, b3_ref,
                           o_ref):
    # Fused input cast: x arrives as f32 (single HBM read), cast to bf16 in vregs.
    x = x_ref[...].astype(jnp.bfloat16)

    # Layer 1: (TB,784)bf16 @ (784,512)bf16 -> f32 acc, +bias, ReLU (f32 on VPU)
    h1 = jnp.dot(x, w1_ref[...], preferred_element_type=jnp.float32)
    h1 = jnp.maximum(h1 + b1_ref[...], 0.0)

    # Layer 2: (TB,512)bf16 @ (512,256)bf16 -> f32 acc, +bias, ReLU
    h2 = jnp.dot(h1.astype(jnp.bfloat16), w2_ref[...],
                 preferred_element_type=jnp.float32)
    h2 = jnp.maximum(h2 + b2_ref[...], 0.0)

    # Layer 3: (TB,256)bf16 @ (256,128)bf16 -> f32 acc, +bias (lane-padded to 128)
    logits = jnp.dot(h2.astype(jnp.bfloat16), w3_ref[...],
                     preferred_element_type=jnp.float32)
    logits = logits + b3_ref[...]

    # Mask the 118 padded lanes so they don't contribute to the softmax.
    col = jax.lax.broadcasted_iota(jnp.int32, logits.shape, 1)
    logits = jnp.where(col < _NUM_CLASSES, logits, jnp.float32(-1e30))

    # Numerically stable LogSoftmax along dim=1 (full-lane reductions).
    m = jnp.max(logits, axis=1, keepdims=True)
    shifted = logits - m
    lse = jnp.log(jnp.sum(jnp.exp(shifted), axis=1, keepdims=True))
    o_ref[...] = shifted - lse


def prepare_params(w1, b1, w2, b2, w3, b3):
    """One-time parameter prep (run once, OUTSIDE the per-step forward):
    cast matmul weights to bf16 and zero-pad layer 3 to 128 output lanes.
    Biases stay f32 (bias add / ReLU / log-softmax run in f32 on the VPU)."""
    w1b = jnp.asarray(w1, jnp.bfloat16)
    w2b = jnp.asarray(w2, jnp.bfloat16)
    w3b = jnp.pad(jnp.asarray(w3, jnp.float32),
                  ((0, 0), (0, _OUT_PAD - w3.shape[1]))).astype(jnp.bfloat16)
    b1f = jnp.asarray(b1, jnp.float32).reshape(1, -1)
    b2f = jnp.asarray(b2, jnp.float32).reshape(1, -1)
    b3f = jnp.pad(jnp.asarray(b3, jnp.float32).reshape(1, -1),
                  ((0, 0), (0, _OUT_PAD - b3.shape[1])))
    return w1b, b1f, w2b, b2f, w3b, b3f


@functools.partial(jax.jit, static_argnames=("tb",))
def neural_network_forward(x, w1b, b1, w2b, b2, w3b, b3, *, tb=1024):
    """Forward pass. `x` is f32 (B,784); weights must come from prepare_params()."""
    B, K = x.shape
    assert K == 784
    assert w1b.dtype == jnp.bfloat16 and w3b.shape[1] == _OUT_PAD, \
        "pass parameters through prepare_params() first"

    TB = _choose_tb(B, tb)
    B_pad = _round_up(B, TB)
    if B_pad != B:   # rare: only for batch sizes with no sublane-aligned divisor
        x = jnp.pad(x, ((0, B_pad - B), (0, 0)))

    grid = (pl.cdiv(B_pad, TB),)
    resident = lambda i: (0, 0)   # weights/biases stay in VMEM across batch tiles

    out = pl.pallas_call(
        _mlp_logsoftmax_kernel,
        out_shape=jax.ShapeDtypeStruct((B_pad, _OUT_PAD), jnp.float32),
        grid_spec=pltpu.PrefetchScalarGridSpec(
            num_scalar_prefetch=0,
            grid=grid,
            in_specs=[
                pl.BlockSpec((TB, 784), lambda i: (i, 0)),        # x tile (f32)
                pl.BlockSpec((784, 512), resident),               # w1 (bf16)
                pl.BlockSpec((1, 512), resident),                 # b1 (f32)
                pl.BlockSpec((512, 256), resident),               # w2 (bf16)
                pl.BlockSpec((1, 256), resident),                 # b2 (f32)
                pl.BlockSpec((256, _OUT_PAD), resident),          # w3 (bf16, padded)
                pl.BlockSpec((1, _OUT_PAD), resident),            # b3 (f32, padded)
            ],
            out_specs=pl.BlockSpec((TB, _OUT_PAD), lambda i: (i, 0)),
        ),
        compiler_params=pltpu.CompilerParams(
            dimension_semantics=("parallel",),     # v7x: shard batch tiles over 2 TCs
            vmem_limit_bytes=32 * 1024 * 1024,     # ~16 MiB used at TB=1024
        ),
    )(x, w1b, b1, w2b, b2, w3b, b3)

    # Only the first 10 lanes are real classes; padded rows/lanes are dropped.
    return out[:B, :_NUM_CLASSES]


def init_params(key):
    """Deterministic parameter init (Kaiming-uniform-like, matching torch shapes)."""
    k1, k2, k3, k4, k5, k6 = jax.random.split(key, 6)

    def linear(kw, kb, fan_in, fan_out):
        bound = 1.0 / jnp.sqrt(fan_in)
        w = jax.random.uniform(kw, (fan_in, fan_out), jnp.float32, -bound, bound)
        b = jax.random.uniform(kb, (1, fan_out), jnp.float32, -bound, bound)
        return w, b

    w1, b1 = linear(k1, k2, 784, 512)
    w2, b2 = linear(k3, k4, 512, 256)
    w3, b3 = linear(k5, k6, 256, 10)
    return w1, b1, w2, b2, w3, b3


def reference_forward(x, w1, b1, w2, b2, w3, b3):
    """JAX reference matching the kernel's bf16-operand / f32-accumulate numerics."""
    bf = jnp.bfloat16
    h1 = jnp.maximum(
        jnp.dot(x.astype(bf), w1.astype(bf), preferred_element_type=jnp.float32) + b1,
        0.0)
    h2 = jnp.maximum(
        jnp.dot(h1.astype(bf), w2.astype(bf), preferred_element_type=jnp.float32) + b2,
        0.0)
    logits = jnp.dot(h2.astype(bf), w3.astype(bf),
                     preferred_element_type=jnp.float32) + b3
    return jax.nn.log_softmax(logits, axis=1)


if __name__ == "__main__":
    key = jax.random.PRNGKey(0)
    kx, kp = jax.random.split(key)

    B = 8  # small test batch
    x = jax.random.normal(kx, (B, 784), dtype=jnp.float32)
    params = init_params(kp)

    # One-time weight prep (bf16 cast + lane padding) outside the forward pass.
    prepped = prepare_params(*params)
    prepped = jax.block_until_ready(prepped)

    out = neural_network_forward(x, *prepped)
    out = jax.block_until_ready(out)

    ref = reference_forward(x, *params)
    assert out.shape == (B, 10)
    assert jnp.allclose(out, ref, atol=2e-3, rtol=2e-3), "mismatch vs JAX reference"

    print("KERNEL_OK")
</pallas_src>

<mosaic_0001>
module attributes {stable_mosaic.version = 11 : i64} {
  func.func @_mlp_logsoftmax_kernel(%arg0: i32, %arg1: memref<8x784xf32, #tpu.memory_space<vmem>>, %arg2: memref<784x512xbf16, #tpu.memory_space<vmem>>, %arg3: memref<1x512xf32, #tpu.memory_space<vmem>>, %arg4: memref<512x256xbf16, #tpu.memory_space<vmem>>, %arg5: memref<1x256xf32, #tpu.memory_space<vmem>>, %arg6: memref<256x128xbf16, #tpu.memory_space<vmem>>, %arg7: memref<1x128xf32, #tpu.memory_space<vmem>>, %arg8: memref<8x128xf32, #tpu.memory_space<vmem>>) attributes {dimension_semantics = [#tpu.dimension_semantics<parallel>], iteration_bounds = array<i64: 1>, scalar_prefetch = 0 : i64, scratch_operands = 0 : i64, tpu.core_type = #tpu.core_type<tc>, window_params = [{transform_indices = @transform_0, window_bounds = array<i64: 8, 784>}, {pipeline_mode = #tpu.pipeline_mode<synchronous>, transform_indices = @transform_1, window_bounds = array<i64: 784, 512>}, {pipeline_mode = #tpu.pipeline_mode<synchronous>, transform_indices = @transform_2, window_bounds = array<i64: 1, 512>}, {pipeline_mode = #tpu.pipeline_mode<synchronous>, transform_indices = @transform_3, window_bounds = array<i64: 512, 256>}, {pipeline_mode = #tpu.pipeline_mode<synchronous>, transform_indices = @transform_4, window_bounds = array<i64: 1, 256>}, {pipeline_mode = #tpu.pipeline_mode<synchronous>, transform_indices = @transform_5, window_bounds = array<i64: 256, 128>}, {pipeline_mode = #tpu.pipeline_mode<synchronous>, transform_indices = @transform_6, window_bounds = array<i64: 1, 128>}, {transform_indices = @transform_7, window_bounds = array<i64: 8, 128>}]} {
    %c0 = arith.constant 0 : index
    %c0_0 = arith.constant 0 : index
    %0 = vector.load %arg1[%c0, %c0_0] : memref<8x784xf32, #tpu.memory_space<vmem>>, vector<8x784xf32>
    %1 = arith.truncf %0 : vector<8x784xf32> to vector<8x784xbf16>
    %c0_1 = arith.constant 0 : index
    %c0_2 = arith.constant 0 : index
    %2 = vector.load %arg2[%c0_1, %c0_2] : memref<784x512xbf16, #tpu.memory_space<vmem>>, vector<784x512xbf16>
    %cst = arith.constant dense<0.000000e+00> : vector<8x512xf32>
    %3 = tpu.matmul %1, %2, %cst {dimension_numbers = #tpu.dot_dimension_numbers<[1], [0], [0], [1], [0, 0, 1, 1], [], []>} : vector<8x784xbf16>, vector<784x512xbf16>, vector<8x512xf32> -> vector<8x512xf32>
    %c0_3 = arith.constant 0 : index
    %c0_4 = arith.constant 0 : index
    %4 = vector.load %arg3[%c0_3, %c0_4] : memref<1x512xf32, #tpu.memory_space<vmem>>, vector<1x512xf32>
    %5 = vector.broadcast %4 : vector<1x512xf32> to vector<8x512xf32>
    %6 = arith.addf %3, %5 : vector<8x512xf32>
    %cst_5 = arith.constant 0.000000e+00 : f32
    %7 = vector.broadcast %cst_5 : f32 to vector<8x512xf32>
    %8 = arith.maximumf %6, %7 : vector<8x512xf32>
    %9 = arith.truncf %8 : vector<8x512xf32> to vector<8x512xbf16>
    %c0_6 = arith.constant 0 : index
    %c0_7 = arith.constant 0 : index
    %10 = vector.load %arg4[%c0_6, %c0_7] : memref<512x256xbf16, #tpu.memory_space<vmem>>, vector<512x256xbf16>
    %cst_8 = arith.constant dense<0.000000e+00> : vector<8x256xf32>
    %11 = tpu.matmul %9, %10, %cst_8 {dimension_numbers = #tpu.dot_dimension_numbers<[1], [0], [0], [1], [0, 0, 1, 1], [], []>} : vector<8x512xbf16>, vector<512x256xbf16>, vector<8x256xf32> -> vector<8x256xf32>
    %c0_9 = arith.constant 0 : index
    %c0_10 = arith.constant 0 : index
    %12 = vector.load %arg5[%c0_9, %c0_10] : memref<1x256xf32, #tpu.memory_space<vmem>>, vector<1x256xf32>
    %13 = vector.broadcast %12 : vector<1x256xf32> to vector<8x256xf32>
    %14 = arith.addf %11, %13 : vector<8x256xf32>
    %cst_11 = arith.constant 0.000000e+00 : f32
    %15 = vector.broadcast %cst_11 : f32 to vector<8x256xf32>
    %16 = arith.maximumf %14, %15 : vector<8x256xf32>
    %17 = arith.truncf %16 : vector<8x256xf32> to vector<8x256xbf16>
    %c0_12 = arith.constant 0 : index
    %c0_13 = arith.constant 0 : index
    %18 = vector.load %arg6[%c0_12, %c0_13] : memref<256x128xbf16, #tpu.memory_space<vmem>>, vector<256x128xbf16>
    %cst_14 = arith.constant dense<0.000000e+00> : vector<8x128xf32>
    %19 = tpu.matmul %17, %18, %cst_14 {dimension_numbers = #tpu.dot_dimension_numbers<[1], [0], [0], [1], [0, 0, 1, 1], [], []>} : vector<8x256xbf16>, vector<256x128xbf16>, vector<8x128xf32> -> vector<8x128xf32>
    %c0_15 = arith.constant 0 : index
    %c0_16 = arith.constant 0 : index
    %20 = vector.load %arg7[%c0_15, %c0_16] : memref<1x128xf32, #tpu.memory_space<vmem>>, vector<1x128xf32>
    %21 = vector.broadcast %20 : vector<1x128xf32> to vector<8x128xf32>
    %22 = arith.addf %19, %21 : vector<8x128xf32>
    %23 = tpu.iota {dimensions = array<i32: 1>} : vector<8x128xi32>
    %c10_i32 = arith.constant 10 : i32
    %24 = vector.broadcast %c10_i32 : i32 to vector<8x128xi32>
    %25 = arith.cmpi slt, %23, %24 : vector<8x128xi32>
    %cst_17 = arith.constant -1.000000e+30 : f32
    %26 = vector.broadcast %cst_17 : f32 to vector<8x128xf32>
    %27 = arith.select %25, %22, %26 : vector<8x128xi1>, vector<8x128xf32>
    %cst_18 = arith.constant dense<0xFF800000> : vector<8xf32>
    %28 = vector.multi_reduction <maximumf>, %27, %cst_18 [1] : vector<8x128xf32> to vector<8xf32>
    %29 = vector.shape_cast %28 : vector<8xf32> to vector<8x1xf32>
    %30 = vector.broadcast %29 : vector<8x1xf32> to vector<8x128xf32>
    %31 = arith.subf %27, %30 : vector<8x128xf32>
    %32 = math.exp %31 : vector<8x128xf32>
    %cst_19 = arith.constant dense<0.000000e+00> : vector<8xf32>
    %33 = vector.multi_reduction <add>, %32, %cst_19 [1] : vector<8x128xf32> to vector<8xf32>
    %34 = vector.shape_cast %33 : vector<8xf32> to vector<8x1xf32>
    %35 = math.log %34 : vector<8x1xf32>
    %36 = vector.broadcast %35 : vector<8x1xf32> to vector<8x128xf32>
    %37 = arith.subf %31, %36 : vector<8x128xf32>
    %c0_20 = arith.constant 0 : index
    %c0_21 = arith.constant 0 : index
    %38 = vector.load %arg8[%c0_20, %c0_21] : memref<8x128xf32, #tpu.memory_space<vmem>>, vector<8x128xf32>
    tpu.vector_store %arg8[%c0_20, %c0_21], %37 {strides = array<i32>} : memref<8x128xf32, #tpu.memory_space<vmem>>, vector<8x128xf32>,
    return
  }
  func.func @transform_0(%arg0: i32) -> (i32, i32) {
    %c0_i32 = arith.constant 0 : i32
    %c0_i32_0 = arith.constant 0 : i32
    return %arg0, %c0_i32 : i32, i32
  }
  func.func @transform_1(%arg0: i32) -> (i32, i32) {
    %c0_i32 = arith.constant 0 : i32
    %c0_i32_0 = arith.constant 0 : i32
    %c0_i32_1 = arith.constant 0 : i32
    return %c0_i32, %c0_i32_0 : i32, i32
  }
  func.func @transform_2(%arg0: i32) -> (i32, i32) {
    %c0_i32 = arith.constant 0 : i32
    %c0_i32_0 = arith.constant 0 : i32
    %c0_i32_1 = arith.constant 0 : i32
    return %c0_i32, %c0_i32_0 : i32, i32
  }
  func.func @transform_3(%arg0: i32) -> (i32, i32) {
    %c0_i32 = arith.constant 0 : i32
    %c0_i32_0 = arith.constant 0 : i32
    %c0_i32_1 = arith.constant 0 : i32
    return %c0_i32, %c0_i32_0 : i32, i32
  }
  func.func @transform_4(%arg0: i32) -> (i32, i32) {
    %c0_i32 = arith.constant 0 : i32
    %c0_i32_0 = arith.constant 0 : i32
    %c0_i32_1 = arith.constant 0 : i32
    return %c0_i32, %c0_i32_0 : i32, i32
  }
  func.func @transform_5(%arg0: i32) -> (i32, i32) {
    %c0_i32 = arith.constant 0 : i32
    %c0_i32_0 = arith.constant 0 : i32
    %c0_i32_1 = arith.constant 0 : i32
    return %c0_i32, %c0_i32_0 : i32, i32
  }
  func.func @transform_6(%arg0: i32) -> (i32, i32) {
    %c0_i32 = arith.constant 0 : i32
    %c0_i32_0 = arith.constant 0 : i32
    %c0_i32_1 = arith.constant 0 : i32
    return %c0_i32, %c0_i32_0 : i32, i32
  }
  func.func @transform_7(%arg0: i32) -> (i32, i32) {
    %c0_i32 = arith.constant 0 : i32
    %c0_i32_0 = arith.constant 0 : i32
    return %arg0, %c0_i32 : i32, i32
  }
}

</mosaic_0001>

<bundles_post_ra>
// kernel: neural_network_forward.1
= control target key start
LH: loop header
LB: loop body
LE: loop exit
PB: predicated region body
PF: predicated region fallthrough
CT: control target
= control target key end

     0   :  { %12 = vsyncpa [#allocation3], 0  ;;  %s3366_s0 = inlined_call_operand.hbm [shape: f32[8,784], index: 0, kind: input, shape index: {}]   ;;  %s3367_s1 = inlined_call_operand.hbm [shape: bf16[784,512], index: 1, kind: input, shape index: {}]   ;;  %s3368_s2 = inlined_call_operand.vmem [shape: f32[1,512], index: 2, kind: input, shape index: {}]   ;;  %s3369_s3 = inlined_call_operand.hbm [shape: bf16[512,256], index: 3, kind: input, shape index: {}]   ;;  %s3370_s4 = inlined_call_operand.vmem [shape: f32[1,256], index: 4, kind: input, shape index: {}]   ;;  %s3371_s5 = inlined_call_operand.hbm [shape: bf16[256,128], index: 5, kind: input, shape index: {}]   ;;  %s3372_s6 = inlined_call_operand.vmem [shape: f32[1,128], index: 6, kind: input, shape index: {}]   ;;  %s3373_s7 = inlined_call_operand.hbm [shape: f32[8,128], index: 7, kind: output, shape index: {}]  }
   0x1   :  { %13 = vsyncpa [#allocation6], 0 }
   0x2   :  { %14 = vsyncpa [#allocation9], 0 }
   0x3   :  { %15 = vsyncpa [#allocation4], 0  ;;  %s3193_s24 = smov [#allocation5]   ;;  %s3075_s28 = scalar_lea.hbm %s3367_s1, 25088 }
   0x4   :  { %s31_s25 = sshll.u32 %s3193_s24, 4  ;;  %p3076_p0 = scmp.ne.s32.totalorder %s3367_s1, %s3075_s28  ;;  %s32_s25 = int_to_ptr.vmem [resolvable:$true] %s31_s25 }
   0x5   :  { %p3079_p1 = scmp.lt.u32.totalorder %s3075_s28, %s3367_s1 }
   0x7   :  { %p3081_p2 = pnand %p3079_p1, %p3076_p0 }
   0x9   :  { %3084 = shalt.err (!%p3081_p2)
}
   0xa   :  { %s3085_s10 = scalar_lea.vmem %s32_s25, 25088  ;;  %p3090_p4 = scmp.lt.s32.totalorder %s32_s25, %s32_s25 }
   0xb   :  { %p3086_p3 = scmp.ne.s32.totalorder %s32_s25, %s3085_s10  ;;  %p3091_p5 = scmp.lt.s32.totalorder %s3085_s10, %s3085_s10 }
   0xd   :  { %p3092_p6 = por %p3091_p5, %p3090_p4 }
   0xf   :  { %p3093_p7 = pnand %p3092_p6, %p3086_p3 }
  0x11   :  { %3096 = shalt.err (!%p3093_p7)
}
  0x12   :  { %s3194_s11 = smov 256   ;;  %s3195_s12 = smov 16  }
  0x13   :  { %37 = dma.hbm_to_vmem [thread:$0]  %s3367_s1, 25088, %s32_s25, [#allocation6], %s3194_s11, %s3194_s11, %s3195_s12  }
  0x14   :  { %s3196_s15 = smov [#allocation2]   ;;  %s3197_s17 = smov [#allocation7]  }
  0x15   :  { %s22_s16 = sshll.u32 %s3196_s15, 4  ;;  %s45_s18 = sshll.u32 %s3197_s17, 4  ;;  %s23_s16 = int_to_ptr.vmem [resolvable:$true] %s22_s16  ;;  %s46_s18 = int_to_ptr.vmem [resolvable:$true] %s45_s18 }
  0x16   :  { %s3097_s21 = scalar_lea.hbm %s3366_s0, 896 }
  0x17   :  { %p3098_p8 = scmp.ne.s32.totalorder %s3366_s0, %s3097_s21  ;;  %p3101_p9 = scmp.lt.u32.totalorder %s3097_s21, %s3366_s0 }
  0x19   :  { %p3103_p10 = pnand %p3101_p9, %p3098_p8 }
  0x1b   :  { %3106 = shalt.err (!%p3103_p10)
}
  0x1c   :  { %s3107_s1 = scalar_lea.vmem %s23_s16, 896  ;;  %p3112_p12 = scmp.lt.s32.totalorder %s23_s16, %s23_s16 }
  0x1d   :  { %p3108_p11 = scmp.ne.s32.totalorder %s23_s16, %s3107_s1  ;;  %p3113_p13 = scmp.lt.s32.totalorder %s3107_s1, %s3107_s1 }
  0x1f   :  { %p3114_p0 = por %p3113_p13, %p3112_p12 }
  0x21   :  { %p3115_p1 = pnand %p3114_p0, %p3108_p11 }
  0x23   :  { %3118 = shalt.err (!%p3115_p1)
}
  0x24   :  { %25 = dma.hbm_to_vmem [thread:$0]  %s3366_s0, 896, %s23_s16, [#allocation3]  }
  0x25   :  { %s3119_s30 = scalar_lea.hbm %s3369_s3, 8192 }
  0x26   :  { %p3120_p2 = scmp.ne.s32.totalorder %s3369_s3, %s3119_s30  ;;  %p3123_p3 = scmp.lt.u32.totalorder %s3119_s30, %s3369_s3 }
  0x28   :  { %p3125_p4 = pnand %p3123_p3, %p3120_p2 }
  0x2a   :  { %3128 = shalt.err (!%p3125_p4)
}
  0x2b   :  { %s3129_s12 = scalar_lea.vmem %s46_s18, 8192  ;;  %p3134_p6 = scmp.lt.s32.totalorder %s46_s18, %s46_s18 }
  0x2c   :  { %p3130_p5 = scmp.ne.s32.totalorder %s46_s18, %s3129_s12  ;;  %p3135_p7 = scmp.lt.s32.totalorder %s3129_s12, %s3129_s12 }
  0x2e   :  { %p3136_p8 = por %p3135_p7, %p3134_p6 }
  0x30   :  { %p3137_p9 = pnand %p3136_p8, %p3130_p5 }
  0x32   :  { %3140 = shalt.err (!%p3137_p9)
}
  0x33   :  { %s3198_s0 = smov 128   ;;  %s3199_s13 = smov 8  }
  0x34   :  { %51 = dma.hbm_to_vmem [thread:$0]  %s3369_s3, 8192, %s46_s18, [#allocation6], %s3198_s0, %s3198_s0, %s3199_s13  }
  0x35   :  { %s3200_s16 = smov [#allocation8]   ;;  %s3141_s21 = scalar_lea.hbm %s3371_s5, 2048 }
  0x36   :  { %s59_s17 = sshll.u32 %s3200_s16, 4  ;;  %p3142_p10 = scmp.ne.s32.totalorder %s3371_s5, %s3141_s21  ;;  %s60_s17 = int_to_ptr.vmem [resolvable:$true] %s59_s17 }
  0x37   :  { %p3145_p11 = scmp.lt.u32.totalorder %s3141_s21, %s3371_s5 }
  0x39   :  { %p3147_p12 = pnand %p3145_p11, %p3142_p10 }
  0x3b   :  { %3150 = shalt.err (!%p3147_p12)
}
  0x3c   :  { %s3151_s1 = scalar_lea.vmem %s60_s17, 2048  ;;  %p3156_p0 = scmp.lt.s32.totalorder %s60_s17, %s60_s17 }
  0x3d   :  { %p3152_p13 = scmp.ne.s32.totalorder %s60_s17, %s3151_s1  ;;  %p3157_p1 = scmp.lt.s32.totalorder %s3151_s1, %s3151_s1 }
  0x3f   :  { %p3158_p2 = por %p3157_p1, %p3156_p0 }
  0x41   :  { %p3159_p3 = pnand %p3158_p2, %p3152_p13 }
  0x43   :  { %3162 = shalt.err (!%p3159_p3)
}
  0x44   :  { %s3201_s3 = smov 64   ;;  %s3202_s18 = smov 4  }
  0x45   :  { %65 = dma.hbm_to_vmem [thread:$0]  %s3371_s5, 2048, %s60_s17, [#allocation9], %s3201_s3, %s3201_s3, %s3202_s18  }
  0x46   :  { %3185 = dma.done.wait [#allocation3], 896  }
  0x47   :  { %3186 = vsyncadd [#allocation3], 4294966400 }
  0x48   :  { %3187 = dma.done.wait [#allocation6], 33280  }
  0x49   :  { %3188 = vsyncadd [#allocation6], 4294934016 }
  0x4a   :  { %3189 = dma.done.wait [#allocation9], 2048  }
  0x4b   :  { %3190 = vsyncadd [#allocation9], 4294965248  ;;  %v2665_v0 = vld [vmem:[#allocation5 + $0x4] ss:$16 sps:$4 sm:$0xff]   ;;  %v2669_v2 = vld [vmem:[#allocation5] ss:$16 sps:$4 sm:$0xff]  }
  0x4c   :  { %v2667_v1 = vld [vmem:[#allocation5 + $0x204] ss:$16 sps:$4 sm:$0xff]   ;;  %1297 = vmatprep.subr.bf16.mxu1 %v2665_v0  ;;  %v2670_v3 = vld [vmem:[#allocation5 + $0x200] ss:$16 sps:$4 sm:$0xff]   ;;  %vm1293_vm0 = vcmask 130048   ;;  %s3204_s8 = smov [#allocation10]  }
  0x4d   :  { %1338 = vmatprep.subr.bf16.mxu0 %v2667_v1  ;;  %v2671_v4 = vld [vmem:[#allocation5 + $0x24] ss:$16 sps:$4 sm:$0xff]   ;;  %1298 = vmatpush1.bf16.msra.mxu1 %v2669_v2  ;;  %v2675_v6 = vld [vmem:[#allocation5 + $0x20] ss:$16 sps:$4 sm:$0xff]   ;;  %s2311_s9 = sshll.u32 %s3204_s8, 4  ;;  %s2312_s9 = int_to_ptr.vmem [resolvable:$true] %s2311_s9 }
  0x4e   :  { %1339 = vmatpush1.bf16.msra.mxu0 %v2670_v3  ;;  %v2673_v5 = vld [vmem:[#allocation5 + $0x224] ss:$16 sps:$4 sm:$0xff]   ;;  %1299 = vmatprep.subr.bf16.mxu1 %v2671_v4  ;;  %v2676_v7 = vld [vmem:[#allocation5 + $0x220] ss:$16 sps:$4 sm:$0xff]   ;;  %v81_v4 = vld [vmem:[#allocation2] sm:$0xff]  ;;  %p3168_p5 = scmp.lt.s32.totalorder %s2312_s9, %s2312_s9 }
  0x4f   :  { %1340 = vmatprep.subr.bf16.mxu0 %v2673_v5  ;;  %v2677_v8 = vld [vmem:[#allocation5 + $0x44] ss:$16 sps:$4 sm:$0xff]   ;;  %v2681_v10 = vld [vmem:[#allocation5 + $0x40] ss:$16 sps:$4 sm:$0xff]  }
  0x50   :  { %v2679_v9 = vld [vmem:[#allocation5 + $0x244] ss:$16 sps:$4 sm:$0xff]   ;;  %v2682_v11 = vld [vmem:[#allocation5 + $0x240] ss:$16 sps:$4 sm:$0xff]  }
  0x51   :  { %1300 = vmatpush1.bf16.msra.mxu1 %v2675_v6  ;;  %v2683_v12 = vld [vmem:[#allocation5 + $0x64] ss:$16 sps:$4 sm:$0xff]   ;;  %v2687_v14 = vld [vmem:[#allocation5 + $0x60] ss:$16 sps:$4 sm:$0xff]   ;;  %v83_v6 = vld [vmem:[#allocation2 + $0x10] sm:$0xff] }
  0x52   :  { %1341 = vmatpush1.bf16.msra.mxu0 %v2676_v7  ;;  %1301 = vmatprep.subr.bf16.mxu1 %v2677_v8  ;;  %v2685_v13 = vld [vmem:[#allocation5 + $0x264] ss:$16 sps:$4 sm:$0xff]   ;;  %v2688_v15 = vld [vmem:[#allocation5 + $0x260] ss:$16 sps:$4 sm:$0xff]   ;;  %v2766_v7 = vld [vmem:[#allocation5 + $0xc] ss:$16 sps:$4 sm:$0xff]   ;;  %v3299_v8 = vpack.c.bf16 %v81_v4, %v81_v4 }
  0x53   :  { %1342 = vmatprep.subr.bf16.mxu0 %v2679_v9  ;;  %v2689_v16 = vld [vmem:[#allocation5 + $0x84] ss:$16 sps:$4 sm:$0xff]   ;;  %v2693_v18 = vld [vmem:[#allocation5 + $0x80] ss:$16 sps:$4 sm:$0xff]   ;;  %v2850_v4 = vld [vmem:[#allocation5 + $0x1cc] ss:$16 sps:$4 sm:$0xff]  }
  0x54   :  { %v2691_v17 = vld [vmem:[#allocation5 + $0x284] ss:$16 sps:$4 sm:$0xff]   ;;  %v2694_v19 = vld [vmem:[#allocation5 + $0x280] ss:$16 sps:$4 sm:$0xff]  }
  0x55   :  { %1302 = vmatpush1.bf16.msra.mxu1 %v2681_v10  ;;  %v2695_v20 = vld [vmem:[#allocation5 + $0xa4] ss:$16 sps:$4 sm:$0xff]   ;;  %v2699_v22 = vld [vmem:[#allocation5 + $0xa0] ss:$16 sps:$4 sm:$0xff]   ;;  %v2764_v10 = vld [vmem:[#allocation5 + $0x8] ss:$16 sps:$4 sm:$0xff]  }
  0x56   :  { %1343 = vmatpush1.bf16.msra.mxu0 %v2682_v11  ;;  %1303 = vmatprep.subr.bf16.mxu1 %v2683_v12  ;;  %v2697_v21 = vld [vmem:[#allocation5 + $0x2a4] ss:$16 sps:$4 sm:$0xff]   ;;  %v2700_v23 = vld [vmem:[#allocation5 + $0x2a0] ss:$16 sps:$4 sm:$0xff]   ;;  %v3301_v11 = vpack.c.bf16 %v83_v6, %v83_v6  ;;  %v2848_v6 = vld [vmem:[#allocation5 + $0x1c8] ss:$16 sps:$4 sm:$0xff]  }
  0x57   :  { %1344 = vmatprep.subr.bf16.mxu0 %v2685_v13  ;;  %v2701_v24 = vld [vmem:[#allocation5 + $0xc4] ss:$16 sps:$4 sm:$0xff]   ;;  %v2705_v26 = vld [vmem:[#allocation5 + $0xc0] ss:$16 sps:$4 sm:$0xff]   ;;  %v2772_v13 = vld [vmem:[#allocation5 + $0x2c] ss:$16 sps:$4 sm:$0xff]  }
  0x58   :  { %v2703_v25 = vld [vmem:[#allocation5 + $0x2c4] ss:$16 sps:$4 sm:$0xff]   ;;  %v2706_v27 = vld [vmem:[#allocation5 + $0x2c0] ss:$16 sps:$4 sm:$0xff]  }
  0x59   :  { %1304 = vmatpush1.bf16.msra.mxu1 %v2687_v14  ;;  %v2707_v28 = vld [vmem:[#allocation5 + $0xe4] ss:$16 sps:$4 sm:$0xff]   ;;  %v2711_v30 = vld [vmem:[#allocation5 + $0xe0] ss:$16 sps:$4 sm:$0xff]  }
  0x5a   :  { %1345 = vmatpush1.bf16.msra.mxu0 %v2688_v15  ;;  %1305 = vmatprep.subr.bf16.mxu1 %v2689_v16  ;;  %v2709_v29 = vld [vmem:[#allocation5 + $0x2e4] ss:$16 sps:$4 sm:$0xff]   ;;  %v2712_v31 = vld [vmem:[#allocation5 + $0x2e0] ss:$16 sps:$4 sm:$0xff]   ;;  %v2770_v15 = vld [vmem:[#allocation5 + $0x28] ss:$16 sps:$4 sm:$0xff]  }
  0x5b   :  { %1346 = vmatprep.subr.bf16.mxu0 %v2691_v17  ;;  %v2713_v32 = vld [vmem:[#allocation5 + $0x104] ss:$16 sps:$4 sm:$0xff]   ;;  %v2717_v34 = vld [vmem:[#allocation5 + $0x100] ss:$16 sps:$4 sm:$0xff]   ;;  %v2778_v17 = vld [vmem:[#allocation5 + $0x4c] ss:$16 sps:$4 sm:$0xff]  }
  0x5c   :  { %v2715_v33 = vld [vmem:[#allocation5 + $0x304] ss:$16 sps:$4 sm:$0xff]   ;;  %v2718_v35 = vld [vmem:[#allocation5 + $0x300] ss:$16 sps:$4 sm:$0xff]  }
  0x5d   :  { %1306 = vmatpush1.bf16.msra.mxu1 %v2693_v18  ;;  %v2719_v36 = vld [vmem:[#allocation5 + $0x124] ss:$16 sps:$4 sm:$0xff]   ;;  %v2723_v38 = vld [vmem:[#allocation5 + $0x120] ss:$16 sps:$4 sm:$0xff]  }
  0x5e   :  { %1347 = vmatpush1.bf16.msra.mxu0 %v2694_v19  ;;  %1307 = vmatprep.subr.bf16.mxu1 %v2695_v20  ;;  %v2721_v37 = vld [vmem:[#allocation5 + $0x324] ss:$16 sps:$4 sm:$0xff]   ;;  %v2724_v39 = vld [vmem:[#allocation5 + $0x320] ss:$16 sps:$4 sm:$0xff]   ;;  %v2776_v19 = vld [vmem:[#allocation5 + $0x48] ss:$16 sps:$4 sm:$0xff]  }
  0x5f   :  { %1348 = vmatprep.subr.bf16.mxu0 %v2697_v21  ;;  %v2725_v40 = vld [vmem:[#allocation5 + $0x144] ss:$16 sps:$4 sm:$0xff]   ;;  %v2729_v42 = vld [vmem:[#allocation5 + $0x140] ss:$16 sps:$4 sm:$0xff]   ;;  %v2784_v21 = vld [vmem:[#allocation5 + $0x6c] ss:$16 sps:$4 sm:$0xff]  }
  0x60   :  { %v2727_v41 = vld [vmem:[#allocation5 + $0x344] ss:$16 sps:$4 sm:$0xff]   ;;  %v2730_v43 = vld [vmem:[#allocation5 + $0x340] ss:$16 sps:$4 sm:$0xff]  }
  0x61   :  { %1308 = vmatpush1.bf16.msra.mxu1 %v2699_v22  ;;  %v2731_v44 = vld [vmem:[#allocation5 + $0x164] ss:$16 sps:$4 sm:$0xff]   ;;  %v2735_v47 = vld [vmem:[#allocation5 + $0x160] ss:$16 sps:$4 sm:$0xff]  }
  0x62   :  { %1349 = vmatpush1.bf16.msra.mxu0 %v2700_v23  ;;  %1309 = vmatprep.subr.bf16.mxu1 %v2701_v24  ;;  %v2733_v45 = vld [vmem:[#allocation5 + $0x364] ss:$16 sps:$4 sm:$0xff]   ;;  %v2736_v50 = vld [vmem:[#allocation5 + $0x360] ss:$16 sps:$4 sm:$0xff]   ;;  %v2782_v23 = vld [vmem:[#allocation5 + $0x68] ss:$16 sps:$4 sm:$0xff]  }
  0x63   :  { %1350 = vmatprep.subr.bf16.mxu0 %v2703_v25  ;;  %v82_v46 = vld [vmem:[#allocation2 + $0x8] sm:$0xff]  ;;  %v84_v49 = vld [vmem:[#allocation2 + $0x18] sm:$0xff]  ;;  %v2790_v25 = vld [vmem:[#allocation5 + $0x8c] ss:$16 sps:$4 sm:$0xff]  }
  0x64   :  { %v3293_v48 = vpack.c.bf16 %v82_v46, %v82_v46  ;;  %v2737_v51 = vld [vmem:[#allocation5 + $0x184] ss:$16 sps:$4 sm:$0xff]   ;;  %v3295_v52 = vpack.c.bf16 %v84_v49, %v84_v49  ;;  %v2741_v54 = vld [vmem:[#allocation5 + $0x180] ss:$16 sps:$4 sm:$0xff]   ;;  %v2818_v49 = vld [vmem:[#allocation5 + $0x128] ss:$16 sps:$4 sm:$0xff]  }
  0x65   :  { %1310 = vmatpush1.bf16.msra.mxu1 %v2705_v26  ;;  %v2739_v53 = vld [vmem:[#allocation5 + $0x384] ss:$16 sps:$4 sm:$0xff]   ;;  %v2742_v55 = vld [vmem:[#allocation5 + $0x380] ss:$16 sps:$4 sm:$0xff]  }
  0x66   :  { %1351 = vmatpush1.bf16.msra.mxu0 %v2706_v27  ;;  %1311 = vmatprep.subr.bf16.mxu1 %v2707_v28  ;;  %v2743_v56 = vld [vmem:[#allocation5 + $0x1a4] ss:$16 sps:$4 sm:$0xff]   ;;  %v2747_v58 = vld [vmem:[#allocation5 + $0x1a0] ss:$16 sps:$4 sm:$0xff]   ;;  %v2788_v27 = vld [vmem:[#allocation5 + $0x88] ss:$16 sps:$4 sm:$0xff]  }
  0x67   :  { %1352 = vmatprep.subr.bf16.mxu0 %v2709_v29  ;;  %1329 = vmatprep.mubr.bf16.mxu1 %v3293_v48  ;;  %v2745_v57 = vld [vmem:[#allocation5 + $0x3a4] ss:$16 sps:$4 sm:$0xff]   ;;  %v2748_v59 = vld [vmem:[#allocation5 + $0x3a0] ss:$16 sps:$4 sm:$0xff]   ;;  %v2796_v29 = vld [vmem:[#allocation5 + $0xac] ss:$16 sps:$4 sm:$0xff]  }
  0x68   :  { %1370 = vmatprep.mubr.bf16.mxu0 %v3295_v52  ;;  %v2749_v60 = vld [vmem:[#allocation5 + $0x1c4] ss:$16 sps:$4 sm:$0xff]   ;;  %v2753_v62 = vld [vmem:[#allocation5 + $0x1c0] ss:$16 sps:$4 sm:$0xff]  }
  0x69   :  { %1312 = vmatpush1.bf16.msra.mxu1 %v2711_v30  ;;  %v2751_v61 = vld [vmem:[#allocation5 + $0x3c4] ss:$16 sps:$4 sm:$0xff]   ;;  %v2754_v63 = vld [vmem:[#allocation5 + $0x3c0] ss:$16 sps:$4 sm:$0xff]  }
  0x6a   :  { %1353 = vmatpush1.bf16.msra.mxu0 %v2712_v31  ;;  %1313 = vmatprep.subr.bf16.mxu1 %v2713_v32  ;;  %v2755_v0 = vld [vmem:[#allocation5 + $0x1e4] ss:$16 sps:$4 sm:$0xff]   ;;  %v2759_v2 = vld [vmem:[#allocation5 + $0x1e0] ss:$16 sps:$4 sm:$0xff]   ;;  %v2794_v31 = vld [vmem:[#allocation5 + $0xa8] ss:$16 sps:$4 sm:$0xff]  }
  0x6b   :  { %1354 = vmatprep.subr.bf16.mxu0 %v2715_v33  ;;  %v2757_v1 = vld [vmem:[#allocation5 + $0x3e4] ss:$16 sps:$4 sm:$0xff]   ;;  %v2760_v3 = vld [vmem:[#allocation5 + $0x3e0] ss:$16 sps:$4 sm:$0xff]   ;;  %v2802_v33 = vld [vmem:[#allocation5 + $0xcc] ss:$16 sps:$4 sm:$0xff]  }
  0x6c   :  { %v2763_v5 = vld [vmem:[#allocation5 + $0x404] ss:$16 sps:$4 sm:$0xff]   ;;  %v2761_v9 = vld [vmem:[#allocation5 + $0x400] ss:$16 sps:$4 sm:$0xff]  }
  0x6d   :  { %1314 = vmatpush1.bf16.msra.mxu1 %v2717_v34  ;;  %v2769_v12 = vld [vmem:[#allocation5 + $0x424] ss:$16 sps:$4 sm:$0xff]   ;;  %v2767_v14 = vld [vmem:[#allocation5 + $0x420] ss:$16 sps:$4 sm:$0xff]  }
  0x6e   :  { %1355 = vmatpush1.bf16.msra.mxu0 %v2718_v35  ;;  %1315 = vmatprep.subr.bf16.mxu1 %v2719_v36  ;;  %v2775_v16 = vld [vmem:[#allocation5 + $0x444] ss:$16 sps:$4 sm:$0xff]   ;;  %v2773_v18 = vld [vmem:[#allocation5 + $0x440] ss:$16 sps:$4 sm:$0xff]  }
  0x6f   :  { %1356 = vmatprep.subr.bf16.mxu0 %v2721_v37  ;;  %v2781_v20 = vld [vmem:[#allocation5 + $0x464] ss:$16 sps:$4 sm:$0xff]   ;;  %v2779_v22 = vld [vmem:[#allocation5 + $0x460] ss:$16 sps:$4 sm:$0xff]   ;;  %v2800_v37 = vld [vmem:[#allocation5 + $0xc8] ss:$16 sps:$4 sm:$0xff]  }
  0x70   :  { %v2787_v24 = vld [vmem:[#allocation5 + $0x484] ss:$16 sps:$4 sm:$0xff]   ;;  %v2785_v26 = vld [vmem:[#allocation5 + $0x480] ss:$16 sps:$4 sm:$0xff]  }
  0x71   :  { %1316 = vmatpush1.bf16.msra.mxu1 %v2723_v38  ;;  %v2793_v28 = vld [vmem:[#allocation5 + $0x4a4] ss:$16 sps:$4 sm:$0xff]   ;;  %v2791_v30 = vld [vmem:[#allocation5 + $0x4a0] ss:$16 sps:$4 sm:$0xff]  }
  0x72   :  { %1357 = vmatpush1.bf16.msra.mxu0 %v2724_v39  ;;  %1317 = vmatprep.subr.bf16.mxu1 %v2725_v40  ;;  %v2799_v32 = vld [vmem:[#allocation5 + $0x4c4] ss:$16 sps:$4 sm:$0xff]   ;;  %v2797_v36 = vld [vmem:[#allocation5 + $0x4c0] ss:$16 sps:$4 sm:$0xff]   ;;  %v2808_v39 = vld [vmem:[#allocation5 + $0xec] ss:$16 sps:$4 sm:$0xff]  }
  0x73   :  { %1358 = vmatprep.subr.bf16.mxu0 %v2727_v41  ;;  %v86_v34 = vld [vmem:[#allocation2 + $0x28] sm:$0xff]  ;;  %v2806_v41 = vld [vmem:[#allocation5 + $0xe8] ss:$16 sps:$4 sm:$0xff]  }
  0x74   :  { %v3306_v35 = vpack.c.bf16 %v86_v34, %v86_v34  ;;  %v2805_v38 = vld [vmem:[#allocation5 + $0x4e4] ss:$16 sps:$4 sm:$0xff]   ;;  %v2803_v40 = vld [vmem:[#allocation5 + $0x4e0] ss:$16 sps:$4 sm:$0xff]   ;;  %v2883_v34 = vld [vmem:[#allocation5 + $0x2ec] ss:$16 sps:$4 sm:$0xff]  }
  0x75   :  { %1318 = vmatpush1.bf16.msra.mxu1 %v2729_v42  ;;  %v2811_v42 = vld [vmem:[#allocation5 + $0x504] ss:$16 sps:$4 sm:$0xff]  }
  0x76   :  { %1359 = vmatpush1.bf16.msra.mxu0 %v2730_v43  ;;  %1319 = vmatprep.subr.bf16.mxu1 %v2731_v44  ;;  %v2814_v43 = vld [vmem:[#allocation5 + $0x10c] ss:$16 sps:$4 sm:$0xff]   ;;  %v2809_v44 = vld [vmem:[#allocation5 + $0x500] ss:$16 sps:$4 sm:$0xff]   ;;  %v2817_v46 = vld [vmem:[#allocation5 + $0x524] ss:$16 sps:$4 sm:$0xff]  }
  0x77   :  { %1360 = vmatprep.subr.bf16.mxu0 %v2733_v45  ;;  %v2812_v45 = vld [vmem:[#allocation5 + $0x108] ss:$16 sps:$4 sm:$0xff]  }
  0x79   :  { %1320 = vmatpush1.bf16.msra.mxu1 %v2735_v47  ;;  %v2820_v47 = vld [vmem:[#allocation5 + $0x12c] ss:$16 sps:$4 sm:$0xff]  }
  0x7a   :  { %1361 = vmatpush1.bf16.msra.mxu0 %v2736_v50  ;;  %1321 = vmatprep.subr.bf16.mxu1 %v2737_v51  ;;  %v2823_v50 = vld [vmem:[#allocation5 + $0x544] ss:$16 sps:$4 sm:$0xff]   ;;  %v2826_v51 = vld [vmem:[#allocation5 + $0x14c] ss:$16 sps:$4 sm:$0xff]  }
  0x7b   :  { %1362 = vmatprep.subr.bf16.mxu0 %v2739_v53  ;;  %v2821_v53 = vld [vmem:[#allocation5 + $0x540] ss:$16 sps:$4 sm:$0xff]  }
  0x7d   :  { %1322 = vmatpush1.bf16.msra.mxu1 %v2741_v54  ;;  %v2824_v54 = vld [vmem:[#allocation5 + $0x148] ss:$16 sps:$4 sm:$0xff]  }
  0x7e   :  { %1363 = vmatpush1.bf16.msra.mxu0 %v2742_v55  ;;  %1323 = vmatprep.subr.bf16.mxu1 %v2743_v56  ;;  %v2829_v55 = vld [vmem:[#allocation5 + $0x564] ss:$16 sps:$4 sm:$0xff]   ;;  %v2832_v56 = vld [vmem:[#allocation5 + $0x16c] ss:$16 sps:$4 sm:$0xff]  }
  0x7f   :  { %1364 = vmatprep.subr.bf16.mxu0 %v2745_v57  ;;  %v2827_v57 = vld [vmem:[#allocation5 + $0x560] ss:$16 sps:$4 sm:$0xff]  }
  0x81   :  { %1324 = vmatpush1.bf16.msra.mxu1 %v2747_v58  ;;  %v2830_v58 = vld [vmem:[#allocation5 + $0x168] ss:$16 sps:$4 sm:$0xff]  }
  0x82   :  { %1365 = vmatpush1.bf16.msra.mxu0 %v2748_v59  ;;  %1325 = vmatprep.subr.bf16.mxu1 %v2749_v60  ;;  %v2835_v59 = vld [vmem:[#allocation5 + $0x584] ss:$16 sps:$4 sm:$0xff]   ;;  %v2838_v60 = vld [vmem:[#allocation5 + $0x18c] ss:$16 sps:$4 sm:$0xff]  }
  0x83   :  { %1366 = vmatprep.subr.bf16.mxu0 %v2751_v61  ;;  %v2833_v61 = vld [vmem:[#allocation5 + $0x580] ss:$16 sps:$4 sm:$0xff]  }
  0x85   :  { %1326 = vmatpush1.bf16.msra.mxu1 %v2753_v62  ;;  %v2836_v62 = vld [vmem:[#allocation5 + $0x188] ss:$16 sps:$4 sm:$0xff]  }
  0x86   :  { %1367 = vmatpush1.bf16.msra.mxu0 %v2754_v63  ;;  %1327 = vmatprep.subr.bf16.mxu1 %v2755_v0  ;;  %v2841_v63 = vld [vmem:[#allocation5 + $0x5a4] ss:$16 sps:$4 sm:$0xff]   ;;  %v2844_v0 = vld [vmem:[#allocation5 + $0x1ac] ss:$16 sps:$4 sm:$0xff]  }
  0x87   :  { %1368 = vmatprep.subr.bf16.mxu0 %v2757_v1  ;;  %v2839_v1 = vld [vmem:[#allocation5 + $0x5a0] ss:$16 sps:$4 sm:$0xff]  }
  0x89   :  { %1328 = vmatpush1.bf16.msra.mxu1 %v2759_v2  ;;  %v2842_v2 = vld [vmem:[#allocation5 + $0x1a8] ss:$16 sps:$4 sm:$0xff]  }
  0x8a   :  { %1369 = vmatpush1.bf16.msra.mxu0 %v2760_v3  ;;  %1461 = vmatprep.subr.bf16.mxu1 %v2766_v7  ;;  %v2847_v3 = vld [vmem:[#allocation5 + $0x5c4] ss:$16 sps:$4 sm:$0xff]  }
  0x8b   :  { %1379 = vmatprep.subr.bf16.mxu0 %v2763_v5  ;;  %v2845_v5 = vld [vmem:[#allocation5 + $0x5c0] ss:$16 sps:$4 sm:$0xff]   ;;  %v2853_v7 = vld [vmem:[#allocation5 + $0x5e4] ss:$16 sps:$4 sm:$0xff]  }
  0x8c   :  { %1330 = vmatmul.mubr.bf16.vlgmr.msra.gmra.mrb[0].mxu1 %v3299_v8 }
  0x8d   :  { %1371 = vmatmul.mubr.bf16.vlgmr.msra.gmra.mrb[0].mxu0 %v3301_v11  ;;  %1462 = vmatpush1.bf16.msra.mxu1 %v2764_v10  ;;  %v2851_v10 = vld [vmem:[#allocation5 + $0x5e0] ss:$16 sps:$4 sm:$0xff]  }
  0x8e   :  { %1380 = vmatpush1.bf16.msra.mxu0 %v2761_v9  ;;  %1463 = vmatprep.subr.bf16.mxu1 %v2772_v13  ;;  %v2856_v9 = vld [vmem:[#allocation5 + $0x1ec] ss:$16 sps:$4 sm:$0xff]  }
  0x8f   :  { %1381 = vmatprep.subr.bf16.mxu0 %v2769_v12  ;;  %1493 = vmatprep.mubr.bf16.mxu1 %v3293_v48  ;;  %v2815_v48 = vld [vmem:[#allocation5 + $0x520] ss:$16 sps:$4 sm:$0xff]   ;;  %v2854_v12 = vld [vmem:[#allocation5 + $0x1e8] ss:$16 sps:$4 sm:$0xff]  }
  0x90   :  { %1411 = vmatprep.mubr.bf16.mxu0 %v3306_v35  ;;  %v85_v13 = vld [vmem:[#allocation2 + $0x20] sm:$0xff] }
  0x91   :  { %1464 = vmatpush1.bf16.msra.mxu1 %v2770_v15  ;;  %v2865_v15 = vld [vmem:[#allocation5 + $0x604] ss:$16 sps:$4 sm:$0xff]  }
  0x92   :  { %1382 = vmatpush1.bf16.msra.mxu0 %v2767_v14  ;;  %1465 = vmatprep.subr.bf16.mxu1 %v2778_v17  ;;  %v2859_v14 = vld [vmem:[#allocation5 + $0x20c] ss:$16 sps:$4 sm:$0xff]   ;;  %v2857_v17 = vld [vmem:[#allocation5 + $0x208] ss:$16 sps:$4 sm:$0xff]  }
  0x93   :  { %1383 = vmatprep.subr.bf16.mxu0 %v2775_v16  ;;  %v3309_v16 = vpack.c.bf16 %v85_v13, %v85_v13  ;;  %v2991_v13 = vld [vmem:[#allocation7 + $0xa4] ss:$8 sps:$4 sm:$0xff]  }
  0x95   :  { %1466 = vmatpush1.bf16.msra.mxu1 %v2776_v19  ;;  %v2862_v19 = vld [vmem:[#allocation5 + $0x22c] ss:$16 sps:$4 sm:$0xff]  }
  0x96   :  { %1384 = vmatpush1.bf16.msra.mxu0 %v2773_v18  ;;  %1467 = vmatprep.subr.bf16.mxu1 %v2784_v21  ;;  %v2863_v18 = vld [vmem:[#allocation5 + $0x600] ss:$16 sps:$4 sm:$0xff]   ;;  %v2860_v21 = vld [vmem:[#allocation5 + $0x228] ss:$16 sps:$4 sm:$0xff]  }
  0x97   :  { %1385 = vmatprep.subr.bf16.mxu0 %v2781_v20  ;;  %v2955_v20 = vld [vmem:[#allocation5 + $0x60c] ss:$16 sps:$4 sm:$0xff]  }
  0x99   :  { %1468 = vmatpush1.bf16.msra.mxu1 %v2782_v23  ;;  %v3203_v23 = vmov 0  }
  0x9a   :  { %1386 = vmatpush1.bf16.msra.mxu0 %v2779_v22  ;;  %1469 = vmatprep.subr.bf16.mxu1 %v2790_v25  ;;  %v2868_v22 = vld [vmem:[#allocation5 + $0x24c] ss:$16 sps:$4 sm:$0xff]  }
  0x9b   :  { %1387 = vmatprep.subr.bf16.mxu0 %v2787_v24  ;;  %v2866_v24 = vld [vmem:[#allocation5 + $0x248] ss:$16 sps:$4 sm:$0xff]  }
  0x9c   :  { %v87_v25 = vld [vmem:[#allocation2 + $0x30] sm:$0xff] }
  0x9d   :  { %1470 = vmatpush1.bf16.msra.mxu1 %v2788_v27  ;;  %v2869_v27 = vld [vmem:[#allocation5 + $0x268] ss:$16 sps:$4 sm:$0xff]  }
  0x9e   :  { %1388 = vmatpush1.bf16.msra.mxu0 %v2785_v26  ;;  %1471 = vmatprep.subr.bf16.mxu1 %v2796_v29  ;;  %v2871_v26 = vld [vmem:[#allocation5 + $0x26c] ss:$16 sps:$4 sm:$0xff]   ;;  %v94_v29 = vpack.c.bf16 %v87_v25, %v87_v25  ;;  %v2995_v25 = vld [vmem:[#allocation7 + $0xc0] ss:$8 sps:$4 sm:$0xff]  }
  0x9f   :  { %1389 = vmatprep.subr.bf16.mxu0 %v2793_v28  ;;  %v2953_v28 = vld [vmem:[#allocation5 + $0x608] ss:$16 sps:$4 sm:$0xff]  }
  0xa1   :  { %1472 = vmatpush1.bf16.msra.mxu1 %v2794_v31  ;;  %v2877_v31 = vld [vmem:[#allocation5 + $0x2ac] ss:$16 sps:$4 sm:$0xff]  }
  0xa2   :  { %1390 = vmatpush1.bf16.msra.mxu0 %v2791_v30  ;;  %1473 = vmatprep.subr.bf16.mxu1 %v2802_v33  ;;  %v2872_v30 = vld [vmem:[#allocation5 + $0x288] ss:$16 sps:$4 sm:$0xff]  }
  0xa3   :  { %1391 = vmatprep.subr.bf16.mxu0 %v2799_v32  ;;  %v2875_v32 = vld [vmem:[#allocation5 + $0x2a8] ss:$16 sps:$4 sm:$0xff]  }
  0xa4   :  { %v2878_v33 = vld [vmem:[#allocation5 + $0x2c8] ss:$16 sps:$4 sm:$0xff]  }
  0xa5   :  { %1474 = vmatpush1.bf16.msra.mxu1 %v2800_v37  ;;  %v2961_v37 = vld [vmem:[#allocation7 + $0x4] ss:$8 sps:$4 sm:$0xff]  }
  0xa6   :  { %1392 = vmatpush1.bf16.msra.mxu0 %v2797_v36  ;;  %1475 = vmatprep.subr.bf16.mxu1 %v2808_v39  ;;  %v2959_v36 = vld [vmem:[#allocation7] ss:$8 sps:$4 sm:$0xff]  }
  0xa7   :  { %1393 = vmatprep.subr.bf16.mxu0 %v2805_v38  ;;  %v2964_v38 = vld [vmem:[#allocation7 + $0x14] ss:$8 sps:$4 sm:$0xff]   ;;  %v2881_v39 = vld [vmem:[#allocation5 + $0x2e8] ss:$16 sps:$4 sm:$0xff]  }
  0xa9   :  { %1476 = vmatpush1.bf16.msra.mxu1 %v2806_v41  ;;  %v2886_v41 = vld [vmem:[#allocation5 + $0x30c] ss:$16 sps:$4 sm:$0xff]  }
  0xaa   :  { %1394 = vmatpush1.bf16.msra.mxu0 %v2803_v40  ;;  %1477 = vmatprep.subr.bf16.mxu1 %v2814_v43  ;;  %v2962_v40 = vld [vmem:[#allocation7 + $0x10] ss:$8 sps:$4 sm:$0xff]  }
  0xab   :  { %1395 = vmatprep.subr.bf16.mxu0 %v2811_v42  ;;  %v2967_v42 = vld [vmem:[#allocation7 + $0x24] ss:$8 sps:$4 sm:$0xff]   ;;  %v2884_v43 = vld [vmem:[#allocation5 + $0x308] ss:$16 sps:$4 sm:$0xff]  }
  0xad   :  { %1478 = vmatpush1.bf16.msra.mxu1 %v2812_v45  ;;  %v2889_v45 = vld [vmem:[#allocation5 + $0x32c] ss:$16 sps:$4 sm:$0xff]  }
  0xae   :  { %1396 = vmatpush1.bf16.msra.mxu0 %v2809_v44  ;;  %1479 = vmatprep.subr.bf16.mxu1 %v2820_v47  ;;  %v2965_v44 = vld [vmem:[#allocation7 + $0x20] ss:$8 sps:$4 sm:$0xff]  }
  0xaf   :  { %1397 = vmatprep.subr.bf16.mxu0 %v2817_v46  ;;  %v2970_v46 = vld [vmem:[#allocation7 + $0x34] ss:$8 sps:$4 sm:$0xff]   ;;  %v2887_v47 = vld [vmem:[#allocation5 + $0x328] ss:$16 sps:$4 sm:$0xff]  }
  0xb1   :  { %1480 = vmatpush1.bf16.msra.mxu1 %v2818_v49  ;;  %v2892_v49 = vld [vmem:[#allocation5 + $0x34c] ss:$16 sps:$4 sm:$0xff]  }
  0xb2   :  { %1398 = vmatpush1.bf16.msra.mxu0 %v2815_v48  ;;  %1481 = vmatprep.subr.bf16.mxu1 %v2826_v51  ;;  %v2968_v48 = vld [vmem:[#allocation7 + $0x30] ss:$8 sps:$4 sm:$0xff]  }
  0xb3   :  { %1399 = vmatprep.subr.bf16.mxu0 %v2823_v50  ;;  %v2973_v50 = vld [vmem:[#allocation7 + $0x44] ss:$8 sps:$4 sm:$0xff]   ;;  %v2890_v51 = vld [vmem:[#allocation5 + $0x348] ss:$16 sps:$4 sm:$0xff]  }
  0xb5   :  { %1482 = vmatpush1.bf16.msra.mxu1 %v2824_v54  ;;  %v2895_v54 = vld [vmem:[#allocation5 + $0x36c] ss:$16 sps:$4 sm:$0xff]  }
  0xb6   :  { %1400 = vmatpush1.bf16.msra.mxu0 %v2821_v53  ;;  %1483 = vmatprep.subr.bf16.mxu1 %v2832_v56  ;;  %v2971_v53 = vld [vmem:[#allocation7 + $0x40] ss:$8 sps:$4 sm:$0xff]  }
  0xb7   :  { %1401 = vmatprep.subr.bf16.mxu0 %v2829_v55  ;;  %v2976_v55 = vld [vmem:[#allocation7 + $0x54] ss:$8 sps:$4 sm:$0xff]   ;;  %v2893_v56 = vld [vmem:[#allocation5 + $0x368] ss:$16 sps:$4 sm:$0xff]  }
  0xb9   :  { %1484 = vmatpush1.bf16.msra.mxu1 %v2830_v58  ;;  %v2898_v58 = vld [vmem:[#allocation5 + $0x38c] ss:$16 sps:$4 sm:$0xff]  }
  0xba   :  { %1402 = vmatpush1.bf16.msra.mxu0 %v2827_v57  ;;  %1485 = vmatprep.subr.bf16.mxu1 %v2838_v60  ;;  %v2974_v57 = vld [vmem:[#allocation7 + $0x50] ss:$8 sps:$4 sm:$0xff]  }
  0xbb   :  { %1403 = vmatprep.subr.bf16.mxu0 %v2835_v59  ;;  %v2979_v59 = vld [vmem:[#allocation7 + $0x64] ss:$8 sps:$4 sm:$0xff]   ;;  %v2896_v60 = vld [vmem:[#allocation5 + $0x388] ss:$16 sps:$4 sm:$0xff]  }
  0xbd   :  { %1486 = vmatpush1.bf16.msra.mxu1 %v2836_v62  ;;  %v2901_v62 = vld [vmem:[#allocation5 + $0x3ac] ss:$16 sps:$4 sm:$0xff]  }
  0xbe   :  { %1404 = vmatpush1.bf16.msra.mxu0 %v2833_v61  ;;  %1487 = vmatprep.subr.bf16.mxu1 %v2844_v0  ;;  %v2977_v61 = vld [vmem:[#allocation7 + $0x60] ss:$8 sps:$4 sm:$0xff]  }
  0xbf   :  { %1405 = vmatprep.subr.bf16.mxu0 %v2841_v63  ;;  %v2982_v63 = vld [vmem:[#allocation7 + $0x74] ss:$8 sps:$4 sm:$0xff]   ;;  %v2899_v0 = vld [vmem:[#allocation5 + $0x3a8] ss:$16 sps:$4 sm:$0xff]  }
  0xc1   :  { %1488 = vmatpush1.bf16.msra.mxu1 %v2842_v2  ;;  %v2904_v2 = vld [vmem:[#allocation5 + $0x3cc] ss:$16 sps:$4 sm:$0xff]  }
  0xc2   :  { %1406 = vmatpush1.bf16.msra.mxu0 %v2839_v1  ;;  %1489 = vmatprep.subr.bf16.mxu1 %v2850_v4  ;;  %v2980_v1 = vld [vmem:[#allocation7 + $0x70] ss:$8 sps:$4 sm:$0xff]  }
  0xc3   :  { %1407 = vmatprep.subr.bf16.mxu0 %v2847_v3  ;;  %v2985_v3 = vld [vmem:[#allocation7 + $0x84] ss:$8 sps:$4 sm:$0xff]   ;;  %v2902_v4 = vld [vmem:[#allocation5 + $0x3c8] ss:$16 sps:$4 sm:$0xff]  }
  0xc5   :  { %1490 = vmatpush1.bf16.msra.mxu1 %v2848_v6  ;;  %v2907_v6 = vld [vmem:[#allocation5 + $0x3ec] ss:$16 sps:$4 sm:$0xff]  }
  0xc6   :  { %1408 = vmatpush1.bf16.msra.mxu0 %v2845_v5  ;;  %1491 = vmatprep.subr.bf16.mxu1 %v2856_v9  ;;  %v2983_v5 = vld [vmem:[#allocation7 + $0x80] ss:$8 sps:$4 sm:$0xff]  }
  0xc7   :  { %1409 = vmatprep.subr.bf16.mxu0 %v2853_v7  ;;  %v2988_v7 = vld [vmem:[#allocation7 + $0x94] ss:$8 sps:$4 sm:$0xff]   ;;  %v2905_v9 = vld [vmem:[#allocation5 + $0x3e8] ss:$16 sps:$4 sm:$0xff]  }
  0xc9   :  { %1492 = vmatpush1.bf16.msra.mxu1 %v2854_v12  ;;  %v2910_v12 = vld [vmem:[#allocation5 + $0x40c] ss:$16 sps:$4 sm:$0xff]  }
  0xca   :  { %1410 = vmatpush1.bf16.msra.mxu0 %v2851_v10  ;;  %1502 = vmatprep.subr.bf16.mxu1 %v2859_v14  ;;  %v2986_v10 = vld [vmem:[#allocation7 + $0x90] ss:$8 sps:$4 sm:$0xff]  }
  0xcb   :  { %1420 = vmatprep.subr.bf16.mxu0 %v2865_v15  ;;  %v2908_v14 = vld [vmem:[#allocation5 + $0x408] ss:$16 sps:$4 sm:$0xff]   ;;  %v2913_v15 = vld [vmem:[#allocation5 + $0x42c] ss:$16 sps:$4 sm:$0xff]  }
  0xcc   :  { %1494 = vmatmul.mubr.bf16.vlgmr.msra.gmra.mrb[4].mxu1 %v3299_v8  ;;  %v2874_v8 = vld [vmem:[#allocation5 + $0x28c] ss:$16 sps:$4 sm:$0xff]  }
  0xcd   :  { %1412 = vmatmul.mubr.bf16.vlgmr.msra.gmra.mrb[0].mxu0 %v3309_v16  ;;  %1503 = vmatpush1.bf16.msra.mxu1 %v2857_v17  ;;  %v2989_v17 = vld [vmem:[#allocation7 + $0xa0] ss:$8 sps:$4 sm:$0xff]  }
  0xce   :  { %1421 = vmatpush1.bf16.msra.mxu0 %v2863_v18  ;;  %1504 = vmatprep.subr.bf16.mxu1 %v2862_v19  ;;  %v2994_v18 = vld [vmem:[#allocation7 + $0xb4] ss:$8 sps:$4 sm:$0xff]   ;;  %v2911_v19 = vld [vmem:[#allocation5 + $0x428] ss:$16 sps:$4 sm:$0xff]  }
  0xcf   :  { %1452 = vmatprep.mubr.bf16.mxu0 %v3203_v23  ;;  %1534 = vmatprep.mubr.bf16.mxu1 %v3295_v52  ;;  %v2880_v52 = vld [vmem:[#allocation5 + $0x2cc] ss:$16 sps:$4 sm:$0xff]  }
  0xd0   :  { %1584 = vmatprep.subr.bf16.mxu0 %v2955_v20  ;;  %v2916_v20 = vld [vmem:[#allocation5 + $0x44c] ss:$16 sps:$4 sm:$0xff]  }
  0xd1   :  { %1505 = vmatpush1.bf16.msra.mxu1 %v2860_v21  ;;  %v2992_v21 = vld [vmem:[#allocation7 + $0xb0] ss:$8 sps:$4 sm:$0xff]  }
  0xd2   :  { %1506 = vmatprep.subr.bf16.mxu1 %v2868_v22  ;;  %v2997_v22 = vld [vmem:[#allocation7 + $0xc4] ss:$8 sps:$4 sm:$0xff]  }
  0xd5   :  { %1507 = vmatpush1.bf16.msra.mxu1 %v2866_v24  ;;  %v2919_v24 = vld [vmem:[#allocation5 + $0x46c] ss:$16 sps:$4 sm:$0xff]  }
  0xd6   :  { %1508 = vmatprep.subr.bf16.mxu1 %v2871_v26  ;;  %v3000_v26 = vld [vmem:[#allocation7 + $0xd4] ss:$8 sps:$4 sm:$0xff]  }
  0xd9   :  { %2518 = vmatmul.mubr.msk.bf16.vlgmr.msra.gmra.mrb[0].mxu0 %vm1293_vm0, %v94_v29  ;;  %1509 = vmatpush1.bf16.msra.mxu1 %v2869_v27  ;;  %v2922_v27 = vld [vmem:[#allocation5 + $0x48c] ss:$16 sps:$4 sm:$0xff]  }
  0xda   :  { %1585 = vmatpush1.bf16.msra.mxu0 %v2953_v28  ;;  %1510 = vmatprep.subr.bf16.mxu1 %v2874_v8  ;;  %v2920_v28 = vld [vmem:[#allocation5 + $0x488] ss:$16 sps:$4 sm:$0xff]  }
  0xdb   :  { %1616 = vmatprep.mubr.bf16.mxu0 %v3203_v23  ;;  %2029 = vmatprep.subr.bf16.mxu0 %v2961_v37  ;;  %v2914_v23 = vld [vmem:[#allocation5 + $0x448] ss:$16 sps:$4 sm:$0xff]   ;;  %v3003_v37 = vld [vmem:[#allocation7 + $0xe4] ss:$8 sps:$4 sm:$0xff]  }
  0xdc   :  { %v2923_v8 = vld [vmem:[#allocation5 + $0x4a8] ss:$16 sps:$4 sm:$0xff]  }
  0xdd   :  { %1511 = vmatpush1.bf16.msra.mxu1 %v2872_v30  ;;  %v2928_v30 = vld [vmem:[#allocation5 + $0x4cc] ss:$16 sps:$4 sm:$0xff]  }
  0xde   :  { %1512 = vmatprep.subr.bf16.mxu1 %v2877_v31  ;;  %v2926_v31 = vld [vmem:[#allocation5 + $0x4c8] ss:$16 sps:$4 sm:$0xff]  }
  0xe1   :  { %2519 = vmatmul.mubr.msk.bf16.vlgmr.msra.gmra.mrb[4].mxu0 %vm1293_vm0, %v94_v29  ;;  %1513 = vmatpush1.bf16.msra.mxu1 %v2875_v32  ;;  %v2925_v29 = vld [vmem:[#allocation5 + $0x4ac] ss:$16 sps:$4 sm:$0xff]  }
  0xe2   :  { %1514 = vmatprep.subr.bf16.mxu1 %v2880_v52  ;;  %2030 = vmatpush1.bf16.msra.mxu0 %v2959_v36  ;;  %v2931_v32 = vld [vmem:[#allocation5 + $0x4ec] ss:$16 sps:$4 sm:$0xff]   ;;  %v2929_v52 = vld [vmem:[#allocation5 + $0x4e8] ss:$16 sps:$4 sm:$0xff]  }
  0xe3   :  { %2031 = vmatprep.subr.bf16.mxu0 %v2964_v38  ;;  %v2937_v36 = vld [vmem:[#allocation5 + $0x52c] ss:$16 sps:$4 sm:$0xff]   ;;  %v3001_v38 = vld [vmem:[#allocation7 + $0xe0] ss:$8 sps:$4 sm:$0xff]  }
  0xe5   :  { %1515 = vmatpush1.bf16.msra.mxu1 %v2878_v33  ;;  %v2934_v33 = vld [vmem:[#allocation5 + $0x50c] ss:$16 sps:$4 sm:$0xff]  }
  0xe6   :  { %1516 = vmatprep.subr.bf16.mxu1 %v2883_v34  ;;  %2032 = vmatpush1.bf16.msra.mxu0 %v2962_v40  ;;  %v2932_v34 = vld [vmem:[#allocation5 + $0x508] ss:$16 sps:$4 sm:$0xff]   ;;  %v2940_v40 = vld [vmem:[#allocation5 + $0x54c] ss:$16 sps:$4 sm:$0xff]  }
  0xe7   :  { %2033 = vmatprep.subr.bf16.mxu0 %v2967_v42  ;;  %v3004_v42 = vld [vmem:[#allocation7 + $0xf0] ss:$8 sps:$4 sm:$0xff]  }
  0xe9   :  { %1517 = vmatpush1.bf16.msra.mxu1 %v2881_v39  ;;  %v2935_v39 = vld [vmem:[#allocation5 + $0x528] ss:$16 sps:$4 sm:$0xff]  }
  0xea   :  { %1518 = vmatprep.subr.bf16.mxu1 %v2886_v41  ;;  %2034 = vmatpush1.bf16.msra.mxu0 %v2965_v44  ;;  %v3006_v41 = vld [vmem:[#allocation7 + $0xf4] ss:$8 sps:$4 sm:$0xff]  }
  0xeb   :  { %2035 = vmatprep.subr.bf16.mxu0 %v2970_v46  ;;  %v2943_v44 = vld [vmem:[#allocation5 + $0x56c] ss:$16 sps:$4 sm:$0xff]   ;;  %v2941_v46 = vld [vmem:[#allocation5 + $0x568] ss:$16 sps:$4 sm:$0xff]  }
  0xed   :  { %1519 = vmatpush1.bf16.msra.mxu1 %v2884_v43  ;;  %v2938_v43 = vld [vmem:[#allocation5 + $0x548] ss:$16 sps:$4 sm:$0xff]  }
  0xee   :  { %1520 = vmatprep.subr.bf16.mxu1 %v2889_v45  ;;  %2036 = vmatpush1.bf16.msra.mxu0 %v2968_v48  ;;  %v3009_v45 = vld [vmem:[#allocation7 + $0x104] ss:$8 sps:$4 sm:$0xff]   ;;  %v2944_v48 = vld [vmem:[#allocation5 + $0x588] ss:$16 sps:$4 sm:$0xff]  }
  0xef   :  { %2037 = vmatprep.subr.bf16.mxu0 %v2973_v50  ;;  %v2947_v50 = vld [vmem:[#allocation5 + $0x5a8] ss:$16 sps:$4 sm:$0xff]  }
  0xf1   :  { %1521 = vmatpush1.bf16.msra.mxu1 %v2887_v47  ;;  %v2946_v47 = vld [vmem:[#allocation5 + $0x58c] ss:$16 sps:$4 sm:$0xff]  }
  0xf2   :  { %1522 = vmatprep.subr.bf16.mxu1 %v2892_v49  ;;  %2038 = vmatpush1.bf16.msra.mxu0 %v2971_v53  ;;  %v2949_v49 = vld [vmem:[#allocation5 + $0x5ac] ss:$16 sps:$4 sm:$0xff]   ;;  %v2950_v53 = vld [vmem:[#allocation5 + $0x5c8] ss:$16 sps:$4 sm:$0xff]  }
  0xf3   :  { %2039 = vmatprep.subr.bf16.mxu0 %v2976_v55  ;;  %v2956_v55 = vld [vmem:[#allocation5 + $0x5e8] ss:$16 sps:$4 sm:$0xff]  }
  0xf5   :  { %1523 = vmatpush1.bf16.msra.mxu1 %v2890_v51  ;;  %v2952_v51 = vld [vmem:[#allocation5 + $0x5cc] ss:$16 sps:$4 sm:$0xff]  }
  0xf6   :  { %1524 = vmatprep.subr.bf16.mxu1 %v2895_v54  ;;  %2040 = vmatpush1.bf16.msra.mxu0 %v2974_v57  ;;  %v2958_v54 = vld [vmem:[#allocation5 + $0x5ec] ss:$16 sps:$4 sm:$0xff]  }
  0xf7   :  { %2041 = vmatprep.subr.bf16.mxu0 %v2979_v59 }
  0xf9   :  { %1525 = vmatpush1.bf16.msra.mxu1 %v2893_v56 }
  0xfa   :  { %1526 = vmatprep.subr.bf16.mxu1 %v2898_v58  ;;  %2042 = vmatpush1.bf16.msra.mxu0 %v2977_v61 }
  0xfb   :  { %2043 = vmatprep.subr.bf16.mxu0 %v2982_v63  ;;  %v3324_v63 = vld [vmem:[%s3368_s2] sm:$0xf] }
  0xfd   :  { %1527 = vmatpush1.bf16.msra.mxu1 %v2896_v60  ;;  %v293_v60 = vlaneseq }
  0xfe   :  { %1528 = vmatprep.subr.bf16.mxu1 %v2901_v62  ;;  %2044 = vmatpush1.bf16.msra.mxu0 %v2980_v1 }
  0xff   :  { %2045 = vmatprep.subr.bf16.mxu0 %v2985_v3  ;;  %v3318_v61 = vshrl.u32 %v293_v60, 7  ;;  %v3055_v3 = vld [vmem:[#allocation8 + $0x40] sm:$0xff]  }
 0x101   :  { %1529 = vmatpush1.bf16.msra.mxu1 %v2899_v0  ;;  %v295_v62 = vsub.s32 0, %v3318_v61  ;;  %v299_v0 = vsub.s32 1, %v3318_v61 }
 0x102   :  { %1530 = vmatprep.subr.bf16.mxu1 %v2904_v2  ;;  %2046 = vmatpush1.bf16.msra.mxu0 %v2983_v5  ;;  %v3057_v5 = vld [vmem:[#allocation8 + $0x48] sm:$0xff]  }
 0x103   :  { %2047 = vmatprep.subr.bf16.mxu0 %v2988_v7  ;;  %v300_v1 = vrot.slane %v3324_v63, %v299_v0 }
 0x105   :  { %1531 = vmatpush1.bf16.msra.mxu1 %v2902_v4  ;;  %v3056_v4 = vld [vmem:[#allocation8] sm:$0xff]  }
 0x106   :  { %1532 = vmatprep.subr.bf16.mxu1 %v2907_v6  ;;  %2048 = vmatpush1.bf16.msra.mxu0 %v2986_v10 }
 0x107   :  { %2049 = vmatprep.subr.bf16.mxu0 %v2991_v13 }
 0x109   :  { %1533 = vmatpush1.bf16.msra.mxu1 %v2905_v9 }
 0x10a   :  { %1543 = vmatprep.subr.bf16.mxu1 %v2910_v12  ;;  %2050 = vmatpush1.bf16.msra.mxu0 %v2989_v17 }
 0x10b   :  { %2051 = vmatprep.subr.bf16.mxu0 %v2994_v18  ;;  %v3059_v18 = vld [vmem:[#allocation8 + $0x50] sm:$0xff]  }
 0x10c   :  { %1535 = vmatmul.mubr.bf16.vlgmr.msra.gmra.mrb[4].mxu1 %v3301_v11  ;;  %v2917_v11 = vld [vmem:[#allocation5 + $0x468] ss:$16 sps:$4 sm:$0xff]  }
 0x10d   :  { %1544 = vmatpush1.bf16.msra.mxu1 %v2908_v14  ;;  %1575 = vmatprep.mubr.bf16.mxu1 %v3306_v35  ;;  %v2998_v35 = vld [vmem:[#allocation7 + $0xd0] ss:$8 sps:$4 sm:$0xff]   ;;  %v3058_v14 = vld [vmem:[#allocation8 + $0x8] sm:$0xff]  }
 0x10e   :  { %1545 = vmatprep.subr.bf16.mxu1 %v2913_v15  ;;  %2052 = vmatpush1.bf16.msra.mxu0 %v2992_v21  ;;  %v3007_v21 = vld [vmem:[#allocation7 + $0x100] ss:$8 sps:$4 sm:$0xff]  }
 0x10f   :  { %2053 = vmatprep.subr.bf16.mxu0 %v2997_v22  ;;  %v3060_v22 = vld [vmem:[#allocation8 + $0x10] sm:$0xff]  }
 0x111   :  { %1546 = vmatpush1.bf16.msra.mxu1 %v2911_v19 }
 0x112   :  { %1547 = vmatprep.subr.bf16.mxu1 %v2916_v20  ;;  %2054 = vmatpush1.bf16.msra.mxu0 %v2995_v25  ;;  %v3061_v25 = vld [vmem:[#allocation8 + $0x58] sm:$0xff]  }
 0x113   :  { %2055 = vmatprep.subr.bf16.mxu0 %v3000_v26 }
 0x115   :  { %1548 = vmatpush1.bf16.msra.mxu1 %v2914_v23 }
 0x116   :  { %1549 = vmatprep.subr.bf16.mxu1 %v2919_v24  ;;  %2056 = vmatpush1.bf16.msra.mxu0 %v2998_v35  ;;  %v3012_v24 = vld [vmem:[#allocation7 + $0x114] ss:$8 sps:$4 sm:$0xff]  }
 0x117   :  { %2057 = vmatprep.subr.bf16.mxu0 %v3003_v37  ;;  %v3021_v37 = vld [vmem:[#allocation7 + $0x144] ss:$8 sps:$4 sm:$0xff]  }
 0x119   :  { %1550 = vmatpush1.bf16.msra.mxu1 %v2917_v11 }
 0x11a   :  { %1551 = vmatprep.subr.bf16.mxu1 %v2922_v27  ;;  %2058 = vmatpush1.bf16.msra.mxu0 %v3001_v38  ;;  %v3010_v27 = vld [vmem:[#allocation7 + $0x110] ss:$8 sps:$4 sm:$0xff]   ;;  %v3019_v38 = vld [vmem:[#allocation7 + $0x140] ss:$8 sps:$4 sm:$0xff]  }
 0x11b   :  { %2059 = vmatprep.subr.bf16.mxu0 %v3006_v41  ;;  %v3027_v41 = vld [vmem:[#allocation7 + $0x164] ss:$8 sps:$4 sm:$0xff]  }
 0x11d   :  { %1552 = vmatpush1.bf16.msra.mxu1 %v2920_v28  ;;  %v3062_v28 = vld [vmem:[#allocation8 + $0x18] sm:$0xff]  }
 0x11e   :  { %1553 = vmatprep.subr.bf16.mxu1 %v2925_v29  ;;  %2060 = vmatpush1.bf16.msra.mxu0 %v3004_v42  ;;  %v3015_v29 = vld [vmem:[#allocation7 + $0x124] ss:$8 sps:$4 sm:$0xff]   ;;  %v3025_v42 = vld [vmem:[#allocation7 + $0x160] ss:$8 sps:$4 sm:$0xff]  }
 0x11f   :  { %2070 = vmatprep.subr.bf16.mxu0 %v3009_v45  ;;  %v3033_v45 = vld [vmem:[#allocation7 + $0x184] ss:$8 sps:$4 sm:$0xff]  }
 0x121   :  { %1554 = vmatpush1.bf16.msra.mxu1 %v2923_v8 }
 0x122   :  { %1555 = vmatprep.subr.bf16.mxu1 %v2928_v30  ;;  %v3063_v30 = vld [vmem:[#allocation8 + $0x60] sm:$0xff]  }
 0x125   :  { %1556 = vmatpush1.bf16.msra.mxu1 %v2926_v31  ;;  %v3013_v31 = vld [vmem:[#allocation7 + $0x120] ss:$8 sps:$4 sm:$0xff]  }
 0x126   :  { %1557 = vmatprep.subr.bf16.mxu1 %v2931_v32  ;;  %v3064_v32 = vld [vmem:[#allocation8 + $0x20] sm:$0xff]  }
 0x129   :  { %1558 = vmatpush1.bf16.msra.mxu1 %v2929_v52  ;;  %v3018_v52 = vld [vmem:[#allocation7 + $0x134] ss:$8 sps:$4 sm:$0xff]  }
 0x12a   :  { %1559 = vmatprep.subr.bf16.mxu1 %v2934_v33  ;;  %v3065_v33 = vld [vmem:[#allocation8 + $0x68] sm:$0xff]  }
 0x12d   :  { %1560 = vmatpush1.bf16.msra.mxu1 %v2932_v34  ;;  %v3016_v34 = vld [vmem:[#allocation7 + $0x130] ss:$8 sps:$4 sm:$0xff]  }
 0x12e   :  { %1561 = vmatprep.subr.bf16.mxu1 %v2937_v36  ;;  %v3066_v36 = vld [vmem:[#allocation8 + $0x28] sm:$0xff]  }
 0x131   :  { %1562 = vmatpush1.bf16.msra.mxu1 %v2935_v39  ;;  %v3024_v39 = vld [vmem:[#allocation7 + $0x154] ss:$8 sps:$4 sm:$0xff]  }
 0x132   :  { %1563 = vmatprep.subr.bf16.mxu1 %v2940_v40  ;;  %v3022_v40 = vld [vmem:[#allocation7 + $0x150] ss:$8 sps:$4 sm:$0xff]  }
 0x135   :  { %1564 = vmatpush1.bf16.msra.mxu1 %v2938_v43  ;;  %v3030_v43 = vld [vmem:[#allocation7 + $0x174] ss:$8 sps:$4 sm:$0xff]  }
 0x136   :  { %1565 = vmatprep.subr.bf16.mxu1 %v2943_v44  ;;  %v3028_v44 = vld [vmem:[#allocation7 + $0x170] ss:$8 sps:$4 sm:$0xff]  }
 0x139   :  { %1566 = vmatpush1.bf16.msra.mxu1 %v2941_v46  ;;  %v3031_v46 = vld [vmem:[#allocation7 + $0x180] ss:$8 sps:$4 sm:$0xff]  }
 0x13a   :  { %1567 = vmatprep.subr.bf16.mxu1 %v2946_v47  ;;  %v3036_v47 = vld [vmem:[#allocation7 + $0x194] ss:$8 sps:$4 sm:$0xff]  }
 0x13d   :  { %1568 = vmatpush1.bf16.msra.mxu1 %v2944_v48  ;;  %v3034_v48 = vld [vmem:[#allocation7 + $0x190] ss:$8 sps:$4 sm:$0xff]  }
 0x13e   :  { %1569 = vmatprep.subr.bf16.mxu1 %v2949_v49  ;;  %v3039_v49 = vld [vmem:[#allocation7 + $0x1a4] ss:$8 sps:$4 sm:$0xff]  }
 0x141   :  { %1570 = vmatpush1.bf16.msra.mxu1 %v2947_v50  ;;  %v3037_v50 = vld [vmem:[#allocation7 + $0x1a0] ss:$8 sps:$4 sm:$0xff]  }
 0x142   :  { %1571 = vmatprep.subr.bf16.mxu1 %v2952_v51  ;;  %v3042_v51 = vld [vmem:[#allocation7 + $0x1b4] ss:$8 sps:$4 sm:$0xff]  }
 0x145   :  { %1572 = vmatpush1.bf16.msra.mxu1 %v2950_v53  ;;  %v3040_v53 = vld [vmem:[#allocation7 + $0x1b0] ss:$8 sps:$4 sm:$0xff]  }
 0x146   :  { %1573 = vmatprep.subr.bf16.mxu1 %v2958_v54  ;;  %v3045_v54 = vld [vmem:[#allocation7 + $0x1c4] ss:$8 sps:$4 sm:$0xff]  }
 0x149   :  { %1574 = vmatpush1.bf16.msra.mxu1 %v2956_v55  ;;  %v3043_v55 = vld [vmem:[#allocation7 + $0x1c0] ss:$8 sps:$4 sm:$0xff]  }
 0x14a   :  { %2601 = vmatprep.subr.bf16.mxu1 %v3055_v3  ;;  %v307_v3 = vsub.s32 3, %v3318_v61 }
 0x14c   :  { %1576 = vmatmul.mubr.bf16.vlgmr.msra.gmra.mrb[4].mxu1 %v3309_v16  ;;  %v296_v16 = vrot.slane %v3324_v63, %v295_v62 }
 0x14d   :  { %2602 = vmatpush3.bf16.msra.mxu1 %v3056_v4 }
 0x14e   :  { %2603 = vmatprep.subr.bf16.mxu1 %v3057_v5  ;;  %v308_v5 = vrot.slane %v3324_v63, %v307_v3 }
 0x151   :  { %2604 = vmatpush3.bf16.msra.mxu1 %v3058_v14 }
 0x152   :  { %2605 = vmatprep.subr.bf16.mxu1 %v3059_v18 }
 0x155   :  { %2606 = vmatpush3.bf16.msra.mxu1 %v3060_v22  ;;  %v3068_v22 = vld [vmem:[#allocation8 + $0x30] sm:$0xff]  }
 0x156   :  { %2607 = vmatprep.subr.bf16.mxu1 %v3061_v25 }
 0x159   :  { %2608 = vmatpush3.bf16.msra.mxu1 %v3062_v28 }
 0x15a   :  { %2609 = vmatprep.subr.bf16.mxu1 %v3063_v30 }
 0x15d   :  { %2610 = vmatpush3.bf16.msra.mxu1 %v3064_v32 }
 0x15e   :  { %2611 = vmatprep.subr.bf16.mxu1 %v3065_v33  ;;  %v2291_v33 = vand.u32 127, %v293_v60 }
 0x15f   :  { %v1331_v56 = vpop.f32.mrb[0].mxu1 }
 0x160   :  { %v1333_v57 = vpop.f32.mrb[1].mxu1  ;;  %v1332_v2 = vadd.f32 %v1331_v56, %v296_v16  ;;  %v3048_v56 = vld [vmem:[#allocation7 + $0x1d4] ss:$8 sps:$4 sm:$0xff]   ;;  %vm2292_vm1 = vcmp.lt.s32.totalorder %v2291_v33, 10 }
 0x161   :  { %v1335_v58 = vpop.f32.mrb[2].mxu1  ;;  %v1334_v6 = vadd.f32 %v1333_v57, %v300_v1  ;;  %2612 = vmatpush3.bf16.msra.mxu1 %v3066_v36  ;;  %v3046_v57 = vld [vmem:[#allocation7 + $0x1d0] ss:$8 sps:$4 sm:$0xff]   ;;  %v3054_v16 = vld [vmem:[#allocation7 + $0x1f4] ss:$8 sps:$4 sm:$0xff]  }
 0x162   :  { %v1336_v59 = vpop.f32.mrb[3].mxu1  ;;  %v3051_v58 = vld [vmem:[#allocation7 + $0x1e4] ss:$8 sps:$4 sm:$0xff]   ;;  %v3052_v1 = vld [vmem:[#allocation7 + $0x1f0] ss:$8 sps:$4 sm:$0xff]  }
 0x163   :  { %v3049_v59 = vld [vmem:[#allocation7 + $0x1e0] ss:$8 sps:$4 sm:$0xff]  }
 0x1ac   :  { %v1454_v7 = vpop.f32.mrb[0].mxu0 }
 0x1ad   :  { %v2624_v9 = vadd.f32 %v1454_v7, %v1332_v2  ;;  %v1456_v10 = vpop.f32.mrb[1].mxu0  ;;  %v303_v2 = vsub.s32 2, %v3318_v61  ;;  %v2584_v61 = vld [vmem:[%s3372_s6] ss:$0 sm:$0xff]  ;;  %s3163_s6 = scalar_lea.vmem %s2312_s9, 128 }
 0x1ae   :  { %v2626_v12 = vadd.f32 %v1456_v10, %v1334_v6  ;;  %v1458_v13 = vpop.f32.mrb[2].mxu0  ;;  %p3164_p4 = scmp.ne.s32.totalorder %s2312_s9, %s3163_s6  ;;  %p3169_p6 = scmp.lt.s32.totalorder %s3163_s6, %s3163_s6 }
 0x1af   :  { %v1625_v15 = vmax.f32 %v2624_v9, 0.0  ;;  %v1459_v17 = vpop.f32.mrb[3].mxu0  ;;  %v304_v4 = vrot.slane %v3324_v63, %v303_v2  ;;  %v3069_v63 = vld [vmem:[#allocation8 + $0x78] sm:$0xff]  }
 0x1b0   :  { %v1626_v19 = vmax.f32 %v2626_v12, 0.0  ;;  %p3170_p7 = por %p3169_p6, %p3168_p5 }
 0x1b1   :  { %v1629_v23 = vpack.c.bf16 %v1625_v15, %v1625_v15 }
 0x1b2   :  { %v1630_v20 = vpack.c.bf16 %v1626_v19, %v1626_v19  ;;  %p3171_p8 = pnand %p3170_p7, %p3164_p4 }
 0x1b4   :  { %2061 = vmatprep.mubr.bf16.mxu0 %v1630_v20  ;;  %v3333_v26 = vpop.f32.mrb[4].mxu0 }
 0x1b5   :  { %2062 = vmatmul.mubr.bf16.vlgmr.msra.gmra.mrb[8].mxu0 %v1629_v23  ;;  %v3335_v11 = vpop.f32.mrb[5].mxu0  ;;  %v3070_v23 = vld [vmem:[#allocation8 + $0x38] sm:$0xff]  }
 0x1b6   :  { %2071 = vmatpush1.bf16.msra.mxu0 %v3007_v21  ;;  %v1622_v35 = vpop.f32.mrb[6].mxu0  ;;  %v3067_v21 = vld [vmem:[#allocation8 + $0x70] sm:$0xff]  }
 0x1b7   :  { %2072 = vmatprep.subr.bf16.mxu0 %v3012_v24  ;;  %v1623_v8 = vpop.f32.mrb[7].mxu0  ;;  %2613 = vmatprep.subr.bf16.mxu1 %v3067_v21  ;;  %v1697_v24 = vld [vmem:[%s3370_s4] sm:$0x3] }
 0x1b8   :  { %2614 = vmatpush3.bf16.msra.mxu1 %v3068_v22  ;;  %v1702_v25 = vrot.slane %v1697_v24, %v295_v62 }
 0x1b9   :  { %2615 = vmatprep.subr.bf16.mxu1 %v3069_v63 }
 0x1ba   :  { %2073 = vmatpush1.bf16.msra.mxu0 %v3010_v27 }
 0x1bb   :  { %2074 = vmatprep.subr.bf16.mxu0 %v3015_v29 }
 0x1bc   :  { %2616 = vmatpush3.bf16.msra.mxu1 %v3070_v23 }
 0x1be   :  { %2075 = vmatpush1.bf16.msra.mxu0 %v3013_v31 }
 0x1bf   :  { %2076 = vmatprep.subr.bf16.mxu0 %v3018_v52 }
 0x1c2   :  { %2077 = vmatpush1.bf16.msra.mxu0 %v3016_v34 }
 0x1c3   :  { %2078 = vmatprep.subr.bf16.mxu0 %v3021_v37 }
 0x1c6   :  { %2079 = vmatpush1.bf16.msra.mxu0 %v3019_v38 }
 0x1c7   :  { %2080 = vmatprep.subr.bf16.mxu0 %v3024_v39 }
 0x1ca   :  { %2081 = vmatpush1.bf16.msra.mxu0 %v3022_v40 }
 0x1cb   :  { %2082 = vmatprep.subr.bf16.mxu0 %v3027_v41 }
 0x1ce   :  { %2083 = vmatpush1.bf16.msra.mxu0 %v3025_v42 }
 0x1cf   :  { %2084 = vmatprep.subr.bf16.mxu0 %v3030_v43 }
 0x1d2   :  { %2085 = vmatpush1.bf16.msra.mxu0 %v3028_v44 }
 0x1d3   :  { %2086 = vmatprep.subr.bf16.mxu0 %v3033_v45 }
 0x1d6   :  { %2087 = vmatpush1.bf16.msra.mxu0 %v3031_v46 }
 0x1d7   :  { %2088 = vmatprep.subr.bf16.mxu0 %v3036_v47 }
 0x1da   :  { %2089 = vmatpush1.bf16.msra.mxu0 %v3034_v48 }
 0x1db   :  { %2090 = vmatprep.subr.bf16.mxu0 %v3039_v49 }
 0x1de   :  { %2091 = vmatpush1.bf16.msra.mxu0 %v3037_v50 }
 0x1df   :  { %2092 = vmatprep.subr.bf16.mxu0 %v3042_v51 }
 0x1e2   :  { %2093 = vmatpush1.bf16.msra.mxu0 %v3040_v53 }
 0x1e3   :  { %2094 = vmatprep.subr.bf16.mxu0 %v3045_v54 }
 0x1e6   :  { %2095 = vmatpush1.bf16.msra.mxu0 %v3043_v55 }
 0x1e7   :  { %2096 = vmatprep.subr.bf16.mxu0 %v3048_v56 }
 0x1ea   :  { %2097 = vmatpush1.bf16.msra.mxu0 %v3046_v57 }
 0x1eb   :  { %2098 = vmatprep.subr.bf16.mxu0 %v3051_v58 }
 0x1ee   :  { %2099 = vmatpush1.bf16.msra.mxu0 %v3049_v59 }
 0x1ef   :  { %2100 = vmatprep.subr.bf16.mxu0 %v3054_v16 }
 0x1f2   :  { %2101 = vmatpush1.bf16.msra.mxu0 %v3052_v1 }
 0x21f   :  { %v1577_v6 = vpop.f32.mrb[4].mxu1 }
 0x220   :  { %v2627_v7 = vadd.f32 %v1577_v6, %v304_v4  ;;  %v1579_v9 = vpop.f32.mrb[5].mxu1 }
 0x221   :  { %v2629_v10 = vadd.f32 %v1579_v9, %v308_v5  ;;  %v1581_v12 = vpop.f32.mrb[6].mxu1 }
 0x222   :  { %v2628_v13 = vadd.f32 %v2627_v7, %v3333_v26  ;;  %v1582_v14 = vpop.f32.mrb[7].mxu1  ;;  %v1706_v26 = vrot.slane %v1697_v24, %v299_v0 }
 0x223   :  { %v2630_v15 = vadd.f32 %v2629_v10, %v3335_v11 }
 0x224   :  { %v1627_v17 = vmax.f32 %v2628_v13, 0.0 }
 0x225   :  { %v1628_v18 = vmax.f32 %v2630_v15, 0.0 }
 0x226   :  { %v1631_v20 = vpack.c.bf16 %v1627_v17, %v1627_v17 }
 0x227   :  { %v1632_v19 = vpack.c.bf16 %v1628_v18, %v1628_v18 }
 0x229   :  { %2102 = vmatprep.mubr.bf16.mxu0 %v1632_v19 }
 0x22a   :  { %2103 = vmatmul.mubr.bf16.vlgmr.msra.gmra.mrb[8].mxu0 %v1631_v20 }
 0x2fd   :  { %v2104_v11 = vpop.f32.mrb[8].mxu0 }
 0x2fe   :  { %v2631_v27 = vadd.f32 %v2104_v11, %v1702_v25  ;;  %v2106_v35 = vpop.f32.mrb[9].mxu0 }
 0x2ff   :  { %v2632_v28 = vadd.f32 %v2106_v35, %v1706_v26  ;;  %v2108_v29 = vpop.f32.mrb[10].mxu0 }
 0x300   :  { %v2111_v8 = vmax.f32 %v2631_v27, 0.0  ;;  %v2109_v30 = vpop.f32.mrb[11].mxu0 }
 0x301   :  { %v2112_v31 = vmax.f32 %v2632_v28, 0.0 }
 0x302   :  { %v2113_v52 = vpack.c.bf16 %v2111_v8, %v2111_v8 }
 0x303   :  { %v2114_v32 = vpack.c.bf16 %v2112_v31, %v2112_v31 }
 0x305   :  { %2282 = vmatprep.mubr.bf16.mxu1 %v2114_v32 }
 0x306   :  { %2283 = vmatmul.mubr.bf16.vlgmr.msra.gmra.mrb[8].mxu1 %v2113_v52 }
 0x3d9   :  { %v2617_v34 = vpop.f32.mrb[8].mxu1 }
 0x3da   :  { %v2618_v36 = vpop.f32.mrb[9].mxu1 }
 0x3db   :  { %v2619_v62 = vadd.f32 %v2618_v36, %v2617_v34  ;;  %v2620_v0 = vpop.f32.mrb[10].mxu1 }
 0x3dc   :  { %v2621_v37 = vpop.f32.mrb[11].mxu1 }
 0x3dd   :  { %v2285_v38 = vadd.f32 %v2619_v62, %v2584_v61 }
 0x3df   :  { %v2293_v39 = vsel %vm2292_vm1, %v2285_v38, -1e+30 }
 0x3e0   :  { %2294 = vmax.xlane.f32.xlu0 %v2293_v39 }
 0x46d   :  { %v2295_v40 = vpop.xlane.xlu0 %2294 }
 0x46e   :  { %v2296_v41 = vsub.f32 %v2293_v39, %v2295_v40 }
 0x470   :  { %v2297_v42 = vmul.f32 1.442695, %v2296_v41 }
 0x472   :  { %3071 = vpow2.f32 %v2297_v42 }
 0x47c   :  { %v3072_v43 = vpop.eup %3071 }
 0x47d   :  { %2299 = vadd.xlane.f32.xlu0 %v3072_v43 }
 0x50a   :  { %v2300_v60 = vpop.xlane.xlu0 %2299 }
 0x50b   :  { %3073 = vlog2.f32 %v2300_v60 }
 0x515   :  { %v3074_v44 = vpop.eup %3073 }
 0x516   :  { %v2302_v45 = vmul.f32 0.6931472, %v3074_v44 }
 0x518   :  { %v2303_v46 = vsub.f32 %v2296_v41, %v2302_v45 }
 0x51a   :  { %2304 = vst [vmem:[#allocation10] sm:$0xff] %v2303_v46 }
 0x51b   :  { %3174 = shalt.err (!%p3171_p8)
}
 0x51c   :  { %s3175_s12 = scalar_lea.hbm %s3373_s7, 128 }
 0x51d   :  { %p3176_p9 = scmp.ne.s32.totalorder %s3373_s7, %s3175_s12  ;;  %p3179_p10 = scmp.lt.u32.totalorder %s3175_s12, %s3373_s7 }
 0x51f   :  { %p3181_p11 = pnand %p3179_p10, %p3176_p9 }
 0x521   :  { %3184 = shalt.err (!%p3181_p11)
}
 0x522   :  { %2314 = dma.vmem_to_hbm [thread:$0]  %s2312_s9, 128, %s3373_s7, [#allocation4]  }
 0x523   :  { %3191 = dma.done.wait [#allocation4], 128  }
 0x524   :  { %3192 = vsyncadd [#allocation4], 4294967168 }
 0x525   :  { %2318 = vsyncpa [#allocation3], 1 }
 0x526   :  { %2319 = vsyncpa [#allocation6], 1 }
 0x527   :  { %2320 = vsyncpa [#allocation9], 1 }
 0x528   :  { %2321 = vsyncpa [#allocation4], 1 }

</bundles_post_ra>
